<compile_context>
chip_gen: v7x
topology: tpu7x:2x2x1
jax: 0.10.0
libtpu: 0.0.40
codegen_flags: <defaults>
</compile_context>

<pallas_src>
import jax
import jax.numpy as jnp
from jax.experimental import pallas as pl
from jax.experimental.pallas import tpu as pltpu

_VMEM_LIMIT = 32 * 1024 * 1024          # explicit scoped-VMEM limit (v5e/v6e/v7x safe)
_TARGET_STEP_BYTES = 6 * 1024 * 1024    # streamed bytes per grid step (amortizes ~0.35us)
_WEIGHT_BUDGET = 2 * 1024 * 1024        # max bytes of (replicated) weights kept in VMEM


# ---------------------------------------------------------------------------
# The single fused Pallas kernel (all BN scales pre-folded into the weights)
# ---------------------------------------------------------------------------
def _fused_kernel(x_ref, m_ref, w1_ref, b1_ref, w2_ref, b2_ref,
                  w3_ref, b3_ref, wm_ref, bm_ref, o_ref):
    """ext1 -> ext2(deconv) -> ext3  +  main_conv1  -> add -> ReLU, per row tile."""
    h = jnp.dot(x_ref[...], w1_ref[...], preferred_element_type=jnp.float32)
    h = jnp.maximum(h + b1_ref[...], 0.0)
    y = jnp.dot(h, w2_ref[...], preferred_element_type=jnp.float32)
    y = jnp.maximum(y + b2_ref[...], 0.0)                 # columns (p, dh, dw, c_int)
    e = jnp.dot(y, w3_ref[...], preferred_element_type=jnp.float32)
    e = jnp.maximum(e + b3_ref[...], 0.0)                 # columns (p, dh, dw, c_out)
    m = jnp.dot(m_ref[...], wm_ref[...], preferred_element_type=jnp.float32)
    o_ref[...] = jnp.maximum(m + bm_ref[...] + e, 0.0).astype(o_ref.dtype)


# ---------------------------------------------------------------------------
# Static (trace-time) tiling helpers
# ---------------------------------------------------------------------------
def _pick_pack(n_rows, lane_channels, weight_bytes_fn,
               max_g=64, weight_budget=_WEIGHT_BUDGET):
    """Largest power-of-two pixel-pack factor g.

    Packing g consecutive pixels into one row (with block-diagonal kron
    weights) makes every streamed tensor lane-dense (last dim -> ~128+), so
    stores lower to full-width vst instead of masked vst.msk.  g must divide
    the row count and keep the replicated weights within the VMEM budget.
    """
    min_c = max(1, min(lane_channels))
    want = 128 // min_c
    if want <= 1:
        return 1
    want = pl.next_power_of_2(want)
    g, cand = 1, 2
    while cand <= min(max_g, want) and n_rows % cand == 0:
        if weight_bytes_fn(cand) > weight_budget:
            break
        g, cand = cand, cand * 2
    return g


def _tile_rows(n_rows, bytes_per_row,
               target_step_bytes=_TARGET_STEP_BYTES, max_rows=8192):
    """Row-tile height: big (amortizes per-step overhead), multiple of 16,
    >=2 grid steps when possible (v7x has 2 TCs), balanced so padding is tiny."""
    n_rows = int(n_rows)
    tm = target_step_bytes // max(1, int(bytes_per_row))
    tm = max(1, min(int(tm), max_rows, n_rows))
    if n_rows >= 32:
        tm = min(tm, -(-n_rows // 2))      # keep >=2 grid steps
    steps = -(-n_rows // tm)
    tm = -(-n_rows // steps)               # balance tiles -> minimal padding
    tm = -(-tm // 16) * 16                 # sublane alignment
    return tm


def _block_diag(w, g):
    """kron(I_g, w): block-diagonal weight so g packed groups share one matmul."""
    if g == 1:
        return w
    return jnp.kron(jnp.eye(g, dtype=w.dtype), w)


def fold_bn(gamma, beta, mean, var, eps=1e-5):
    scale = gamma / jnp.sqrt(var + eps)
    return scale, beta - mean * scale


def _unpool_to_l(x, indices, h, w):
    """MaxUnpool2d(2,2) scattered directly into layout L: (N*H*W*4, C_in).

    Pure data movement, done in plain JAX (data-dependent scatter).  Handles
    arbitrary flat indices into the (2H, 2W) plane (PyTorch semantics)."""
    n, c, _, _ = x.shape
    w2 = 2 * w
    idx = indices.astype(jnp.int32)
    y = idx // w2
    xx = idx % w2
    nn = jnp.arange(n, dtype=jnp.int32)[:, None, None, None]
    rows = (((nn * h + y // 2) * w + xx // 2) * 2 + (y % 2)) * 2 + (xx % 2)
    cols = jnp.broadcast_to(
        jnp.arange(c, dtype=jnp.int32)[None, :, None, None], rows.shape)
    out = jnp.zeros((n * h * w * 4, c), x.dtype)
    return out.at[rows, cols].set(x)


# ---------------------------------------------------------------------------
# UpsamplingBottleneck forward
# ---------------------------------------------------------------------------
def upsampling_bottleneck(x, max_indices, params):
    """x, max_indices: (N, C_in, H, W) NCHW.  Returns (N, C_out, 2H, 2W)."""
    n, c_in, h, w = x.shape
    c_int = params["w_ext1"].shape[1]
    c_out = params["w_main"].shape[1]
    m1 = n * h * w

    def wbytes(g):  # replicated-weight bytes for pack factor g
        return 4 * g * g * (c_in * c_int + 4 * c_int * c_int
                            + 16 * c_int * c_out + 16 * c_in * c_out)

    g = _pick_pack(m1, (c_in, 4 * c_int, 4 * c_out), wbytes)
    g4 = 4 * g

    # Fold BN into the weights/biases (inference mode).
    s1, b1 = fold_bn(*params["bn1"])
    s2, b2 = fold_bn(*params["bn2"])
    s3, b3 = fold_bn(*params["bn3"])
    sm, bm = fold_bn(*params["bn_main"])

    # Block-diagonal (kron) weights; columns of w_ext2_flat are (dh, dw, co).
    w1k = _block_diag((params["w_ext1"] * s1[None, :]).astype(jnp.float32), g)
    w2k = _block_diag((params["w_ext2_flat"]
                       * jnp.tile(s2, 4)[None, :]).astype(jnp.float32), g)
    w3k = _block_diag((params["w_ext3"] * s3[None, :]).astype(jnp.float32), g4)
    wmk = _block_diag((params["w_main"] * sm[None, :]).astype(jnp.float32), g4)
    b1t = jnp.tile(b1, g).reshape(1, -1).astype(jnp.float32)
    b2t = jnp.tile(b2, g4).reshape(1, -1).astype(jnp.float32)
    b3t = jnp.tile(b3, g4).reshape(1, -1).astype(jnp.float32)
    bmt = jnp.tile(bm, g4).reshape(1, -1).astype(jnp.float32)

    rows = m1 // g
    # Extension input, NHWC-flat and pixel-packed.
    x_flat = jnp.transpose(x, (0, 2, 3, 1)).reshape(rows, g * c_in)
    # Main branch: unpool scattered straight into layout L, then pixel-packed.
    main_p = _unpool_to_l(x, max_indices, h, w).reshape(rows, g4 * c_in)

    bpr = (g * c_in + g4 * c_in + g4 * c_out) * 4     # streamed bytes per row
    tm = _tile_rows(rows, bpr)
    steps = pl.cdiv(rows, tm)
    rows_p = steps * tm
    if rows_p != rows:
        x_flat = jnp.pad(x_flat, ((0, rows_p - rows), (0, 0)))
        main_p = jnp.pad(main_p, ((0, rows_p - rows), (0, 0)))

    out = pl.pallas_call(
        _fused_kernel,
        out_shape=jax.ShapeDtypeStruct((rows_p, g4 * c_out), jnp.float32),
        grid=(steps,),
        in_specs=[
            pl.BlockSpec((tm, g * c_in), lambda i: (i, 0)),
            pl.BlockSpec((tm, g4 * c_in), lambda i: (i, 0)),
            pl.BlockSpec(w1k.shape, lambda i: (0, 0)),
            pl.BlockSpec(b1t.shape, lambda i: (0, 0)),
            pl.BlockSpec(w2k.shape, lambda i: (0, 0)),
            pl.BlockSpec(b2t.shape, lambda i: (0, 0)),
            pl.BlockSpec(w3k.shape, lambda i: (0, 0)),
            pl.BlockSpec(b3t.shape, lambda i: (0, 0)),
            pl.BlockSpec(wmk.shape, lambda i: (0, 0)),
            pl.BlockSpec(bmt.shape, lambda i: (0, 0)),
        ],
        out_specs=pl.BlockSpec((tm, g4 * c_out), lambda i: (i, 0)),
        compiler_params=pltpu.CompilerParams(
            dimension_semantics=("parallel",),
            vmem_limit_bytes=_VMEM_LIMIT),
    )(x_flat, main_p, w1k, b1t, w2k, b2t, w3k, b3t, wmk, bmt)
    if rows_p != rows:
        out = out[:rows]

    # Layout L (n,h,w,dh,dw,c) -> NCHW in the single, unavoidable final pass.
    out = out.reshape(n, h, w, 2, 2, c_out)
    return jnp.transpose(out, (0, 5, 1, 3, 2, 4)).reshape(n, c_out, 2 * h, 2 * w)


# ---------------------------------------------------------------------------
# Pure-JAX reference (independent of layout L / pixel packing) for checking.
# ---------------------------------------------------------------------------
def reference(x, max_indices, params):
    n, c_in, h, w = x.shape
    h2, w2 = 2 * h, 2 * w
    c_int = params["w_ext1"].shape[1]
    c_out = params["w_main"].shape[1]

    xm = jnp.transpose(x, (0, 2, 3, 1)).reshape(-1, c_in)
    s1, b1 = fold_bn(*params["bn1"])
    e = jnp.maximum(xm @ params["w_ext1"] * s1 + b1, 0.0)
    s2, b2 = fold_bn(*params["bn2"])
    e = jnp.maximum(e @ params["w_ext2_flat"] * jnp.tile(s2, 4)
                    + jnp.tile(b2, 4), 0.0)
    e = e.reshape(n, h, w, 2, 2, c_int)
    e = jnp.transpose(e, (0, 1, 3, 2, 4, 5)).reshape(n * h2 * w2, c_int)
    s3, b3 = fold_bn(*params["bn3"])
    e = jnp.maximum(e @ params["w_ext3"] * s3 + b3, 0.0)

    nc = n * c_in
    main = jnp.zeros((nc, h2 * w2), x.dtype)
    main = main.at[jnp.arange(nc)[:, None],
                   max_indices.reshape(nc, -1).astype(jnp.int32)].set(
                       x.reshape(nc, -1))
    main = main.reshape(n, c_in, h2, w2)
    mm = jnp.transpose(main, (0, 2, 3, 1)).reshape(-1, c_in)
    sm, bm = fold_bn(*params["bn_main"])
    o = jnp.maximum(mm @ params["w_main"] * sm + bm + e, 0.0)
    return jnp.transpose(o.reshape(n, h2, w2, c_out), (0, 3, 1, 2))


# ---------------------------------------------------------------------------
def make_params(key, c_in, c_out, internal_ratio=4):
    c_int = c_in // internal_ratio
    ks = jax.random.split(key, 8)

    def bn(k, c):
        a, b, c_, d = jax.random.split(k, 4)
        gamma = 1.0 + 0.1 * jax.random.normal(a, (c,), jnp.float32)
        beta = 0.1 * jax.random.normal(b, (c,), jnp.float32)
        mean = 0.1 * jax.random.normal(c_, (c,), jnp.float32)
        var = jnp.abs(jax.random.normal(d, (c,), jnp.float32)) + 0.5
        return gamma, beta, mean, var

    # ConvTranspose2d weight (C_int, C_int, 2, 2) -> (ci, kh, kw, co) -> (C_int, 4*C_int)
    w_t = 0.1 * jax.random.normal(ks[2], (c_int, c_int, 2, 2), jnp.float32)
    w_t_flat = jnp.transpose(w_t, (0, 2, 3, 1)).reshape(c_int, 4 * c_int)

    return dict(
        w_main=0.1 * jax.random.normal(ks[0], (c_in, c_out), jnp.float32),
        w_ext1=0.1 * jax.random.normal(ks[1], (c_in, c_int), jnp.float32),
        w_ext2_flat=w_t_flat,
        w_ext3=0.1 * jax.random.normal(ks[3], (c_int, c_out), jnp.float32),
        bn_main=bn(ks[4], c_out),
        bn1=bn(ks[5], c_int),
        bn2=bn(ks[6], c_int),
        bn3=bn(ks[7], c_out),
    )


if __name__ == "__main__":
    key = jax.random.PRNGKey(0)
    k_x, k_dh, k_dw, k_p = jax.random.split(key, 4)

    N, C_IN, C_OUT, H, W = 2, 8, 4, 16, 16   # internal_ratio=4 -> C_int=2
    H2, W2 = 2 * H, 2 * W

    x = jax.random.normal(k_x, (N, C_IN, H, W), jnp.float32)

    # max-pool-style indices: each (h,w) picks one cell of its 2x2 block in the
    # (2H, 2W) output plane, flat index into H2*W2 (matches MaxPool2d indices).
    dh = jax.random.randint(k_dh, (N, C_IN, H, W), 0, 2)
    dw = jax.random.randint(k_dw, (N, C_IN, H, W), 0, 2)
    rows_i = 2 * jnp.arange(H)[None, None, :, None] + dh
    cols_i = 2 * jnp.arange(W)[None, None, None, :] + dw
    max_indices = (rows_i * W2 + cols_i).astype(jnp.int32)

    params = make_params(k_p, C_IN, C_OUT, internal_ratio=4)

    fwd = jax.jit(upsampling_bottleneck)

    out = jax.block_until_ready(fwd(x, max_indices, params))
    ref = jax.block_until_ready(reference(x, max_indices, params))
    assert out.shape == (N, C_OUT, H2, W2), out.shape
    assert jnp.allclose(out, ref, atol=1e-4, rtol=1e-4), "mismatch vs reference"

    print("KERNEL_OK")
</pallas_src>

<mosaic_0001>
module attributes {stable_mosaic.version = 11 : i64} {
  func.func @_fused_kernel(%arg0: i32, %arg1: memref<16x128xf32, #tpu.memory_space<vmem>>, %arg2: memref<16x512xf32, #tpu.memory_space<vmem>>, %arg3: memref<128x32xf32, #tpu.memory_space<vmem>>, %arg4: memref<1x32xf32, #tpu.memory_space<vmem>>, %arg5: memref<32x128xf32, #tpu.memory_space<vmem>>, %arg6: memref<1x128xf32, #tpu.memory_space<vmem>>, %arg7: memref<128x256xf32, #tpu.memory_space<vmem>>, %arg8: memref<1x256xf32, #tpu.memory_space<vmem>>, %arg9: memref<512x256xf32, #tpu.memory_space<vmem>>, %arg10: memref<1x256xf32, #tpu.memory_space<vmem>>, %arg11: memref<16x256xf32, #tpu.memory_space<vmem>>) attributes {dimension_semantics = [#tpu.dimension_semantics<parallel>], iteration_bounds = array<i64: 2>, scalar_prefetch = 0 : i64, scratch_operands = 0 : i64, tpu.core_type = #tpu.core_type<tc>, window_params = [{transform_indices = @transform_0, window_bounds = array<i64: 16, 128>}, {transform_indices = @transform_1, window_bounds = array<i64: 16, 512>}, {pipeline_mode = #tpu.pipeline_mode<synchronous>, transform_indices = @transform_2, window_bounds = array<i64: 128, 32>}, {pipeline_mode = #tpu.pipeline_mode<synchronous>, transform_indices = @transform_3, window_bounds = array<i64: 1, 32>}, {pipeline_mode = #tpu.pipeline_mode<synchronous>, transform_indices = @transform_4, window_bounds = array<i64: 32, 128>}, {pipeline_mode = #tpu.pipeline_mode<synchronous>, transform_indices = @transform_5, window_bounds = array<i64: 1, 128>}, {pipeline_mode = #tpu.pipeline_mode<synchronous>, transform_indices = @transform_6, window_bounds = array<i64: 128, 256>}, {pipeline_mode = #tpu.pipeline_mode<synchronous>, transform_indices = @transform_7, window_bounds = array<i64: 1, 256>}, {pipeline_mode = #tpu.pipeline_mode<synchronous>, transform_indices = @transform_8, window_bounds = array<i64: 512, 256>}, {pipeline_mode = #tpu.pipeline_mode<synchronous>, transform_indices = @transform_9, window_bounds = array<i64: 1, 256>}, {transform_indices = @transform_10, window_bounds = array<i64: 16, 256>}]} {
    %c0 = arith.constant 0 : index
    %c0_0 = arith.constant 0 : index
    %0 = vector.load %arg1[%c0, %c0_0] : memref<16x128xf32, #tpu.memory_space<vmem>>, vector<16x128xf32>
    %c0_1 = arith.constant 0 : index
    %c0_2 = arith.constant 0 : index
    %1 = vector.load %arg3[%c0_1, %c0_2] : memref<128x32xf32, #tpu.memory_space<vmem>>, vector<128x32xf32>
    %cst = arith.constant dense<0.000000e+00> : vector<16x32xf32>
    %2 = tpu.matmul %0, %1, %cst {dimension_numbers = #tpu.dot_dimension_numbers<[1], [0], [0], [1], [0, 0, 1, 1], [], []>} : vector<16x128xf32>, vector<128x32xf32>, vector<16x32xf32> -> vector<16x32xf32>
    %c0_3 = arith.constant 0 : index
    %c0_4 = arith.constant 0 : index
    %3 = vector.load %arg4[%c0_3, %c0_4] : memref<1x32xf32, #tpu.memory_space<vmem>>, vector<1x32xf32>
    %4 = vector.broadcast %3 : vector<1x32xf32> to vector<16x32xf32>
    %5 = arith.addf %2, %4 : vector<16x32xf32>
    %cst_5 = arith.constant 0.000000e+00 : f32
    %6 = vector.broadcast %cst_5 : f32 to vector<16x32xf32>
    %7 = arith.maximumf %5, %6 : vector<16x32xf32>
    %c0_6 = arith.constant 0 : index
    %c0_7 = arith.constant 0 : index
    %8 = vector.load %arg5[%c0_6, %c0_7] : memref<32x128xf32, #tpu.memory_space<vmem>>, vector<32x128xf32>
    %cst_8 = arith.constant dense<0.000000e+00> : vector<16x128xf32>
    %9 = tpu.matmul %7, %8, %cst_8 {dimension_numbers = #tpu.dot_dimension_numbers<[1], [0], [0], [1], [0, 0, 1, 1], [], []>} : vector<16x32xf32>, vector<32x128xf32>, vector<16x128xf32> -> vector<16x128xf32>
    %c0_9 = arith.constant 0 : index
    %c0_10 = arith.constant 0 : index
    %10 = vector.load %arg6[%c0_9, %c0_10] : memref<1x128xf32, #tpu.memory_space<vmem>>, vector<1x128xf32>
    %11 = vector.broadcast %10 : vector<1x128xf32> to vector<16x128xf32>
    %12 = arith.addf %9, %11 : vector<16x128xf32>
    %cst_11 = arith.constant 0.000000e+00 : f32
    %13 = vector.broadcast %cst_11 : f32 to vector<16x128xf32>
    %14 = arith.maximumf %12, %13 : vector<16x128xf32>
    %c0_12 = arith.constant 0 : index
    %c0_13 = arith.constant 0 : index
    %15 = vector.load %arg7[%c0_12, %c0_13] : memref<128x256xf32, #tpu.memory_space<vmem>>, vector<128x256xf32>
    %cst_14 = arith.constant dense<0.000000e+00> : vector<16x256xf32>
    %16 = tpu.matmul %14, %15, %cst_14 {dimension_numbers = #tpu.dot_dimension_numbers<[1], [0], [0], [1], [0, 0, 1, 1], [], []>} : vector<16x128xf32>, vector<128x256xf32>, vector<16x256xf32> -> vector<16x256xf32>
    %c0_15 = arith.constant 0 : index
    %c0_16 = arith.constant 0 : index
    %17 = vector.load %arg8[%c0_15, %c0_16] : memref<1x256xf32, #tpu.memory_space<vmem>>, vector<1x256xf32>
    %18 = vector.broadcast %17 : vector<1x256xf32> to vector<16x256xf32>
    %19 = arith.addf %16, %18 : vector<16x256xf32>
    %cst_17 = arith.constant 0.000000e+00 : f32
    %20 = vector.broadcast %cst_17 : f32 to vector<16x256xf32>
    %21 = arith.maximumf %19, %20 : vector<16x256xf32>
    %c0_18 = arith.constant 0 : index
    %c0_19 = arith.constant 0 : index
    %22 = vector.load %arg2[%c0_18, %c0_19] : memref<16x512xf32, #tpu.memory_space<vmem>>, vector<16x512xf32>
    %c0_20 = arith.constant 0 : index
    %c0_21 = arith.constant 0 : index
    %23 = vector.load %arg9[%c0_20, %c0_21] : memref<512x256xf32, #tpu.memory_space<vmem>>, vector<512x256xf32>
    %cst_22 = arith.constant dense<0.000000e+00> : vector<16x256xf32>
    %24 = tpu.matmul %22, %23, %cst_22 {dimension_numbers = #tpu.dot_dimension_numbers<[1], [0], [0], [1], [0, 0, 1, 1], [], []>} : vector<16x512xf32>, vector<512x256xf32>, vector<16x256xf32> -> vector<16x256xf32>
    %c0_23 = arith.constant 0 : index
    %c0_24 = arith.constant 0 : index
    %25 = vector.load %arg10[%c0_23, %c0_24] : memref<1x256xf32, #tpu.memory_space<vmem>>, vector<1x256xf32>
    %26 = vector.broadcast %25 : vector<1x256xf32> to vector<16x256xf32>
    %27 = arith.addf %24, %26 : vector<16x256xf32>
    %28 = arith.addf %27, %21 : vector<16x256xf32>
    %cst_25 = arith.constant 0.000000e+00 : f32
    %29 = vector.broadcast %cst_25 : f32 to vector<16x256xf32>
    %30 = arith.maximumf %28, %29 : vector<16x256xf32>
    %c0_26 = arith.constant 0 : index
    %c0_27 = arith.constant 0 : index
    %31 = vector.load %arg11[%c0_26, %c0_27] : memref<16x256xf32, #tpu.memory_space<vmem>>, vector<16x256xf32>
    tpu.vector_store %arg11[%c0_26, %c0_27], %30 {strides = array<i32>} : memref<16x256xf32, #tpu.memory_space<vmem>>, vector<16x256xf32>,
    return
  }
  func.func @transform_0(%arg0: i32) -> (i32, i32) {
    %c0_i32 = arith.constant 0 : i32
    %c0_i32_0 = arith.constant 0 : i32
    return %arg0, %c0_i32 : i32, i32
  }
  func.func @transform_1(%arg0: i32) -> (i32, i32) {
    %c0_i32 = arith.constant 0 : i32
    %c0_i32_0 = arith.constant 0 : i32
    return %arg0, %c0_i32 : i32, i32
  }
  func.func @transform_2(%arg0: i32) -> (i32, i32) {
    %c0_i32 = arith.constant 0 : i32
    %c0_i32_0 = arith.constant 0 : i32
    %c0_i32_1 = arith.constant 0 : i32
    return %c0_i32, %c0_i32_0 : i32, i32
  }
  func.func @transform_3(%arg0: i32) -> (i32, i32) {
    %c0_i32 = arith.constant 0 : i32
    %c0_i32_0 = arith.constant 0 : i32
    %c0_i32_1 = arith.constant 0 : i32
    return %c0_i32, %c0_i32_0 : i32, i32
  }
  func.func @transform_4(%arg0: i32) -> (i32, i32) {
    %c0_i32 = arith.constant 0 : i32
    %c0_i32_0 = arith.constant 0 : i32
    %c0_i32_1 = arith.constant 0 : i32
    return %c0_i32, %c0_i32_0 : i32, i32
  }
  func.func @transform_5(%arg0: i32) -> (i32, i32) {
    %c0_i32 = arith.constant 0 : i32
    %c0_i32_0 = arith.constant 0 : i32
    %c0_i32_1 = arith.constant 0 : i32
    return %c0_i32, %c0_i32_0 : i32, i32
  }
  func.func @transform_6(%arg0: i32) -> (i32, i32) {
    %c0_i32 = arith.constant 0 : i32
    %c0_i32_0 = arith.constant 0 : i32
    %c0_i32_1 = arith.constant 0 : i32
    return %c0_i32, %c0_i32_0 : i32, i32
  }
  func.func @transform_7(%arg0: i32) -> (i32, i32) {
    %c0_i32 = arith.constant 0 : i32
    %c0_i32_0 = arith.constant 0 : i32
    %c0_i32_1 = arith.constant 0 : i32
    return %c0_i32, %c0_i32_0 : i32, i32
  }
  func.func @transform_8(%arg0: i32) -> (i32, i32) {
    %c0_i32 = arith.constant 0 : i32
    %c0_i32_0 = arith.constant 0 : i32
    %c0_i32_1 = arith.constant 0 : i32
    return %c0_i32, %c0_i32_0 : i32, i32
  }
  func.func @transform_9(%arg0: i32) -> (i32, i32) {
    %c0_i32 = arith.constant 0 : i32
    %c0_i32_0 = arith.constant 0 : i32
    %c0_i32_1 = arith.constant 0 : i32
    return %c0_i32, %c0_i32_0 : i32, i32
  }
  func.func @transform_10(%arg0: i32) -> (i32, i32) {
    %c0_i32 = arith.constant 0 : i32
    %c0_i32_0 = arith.constant 0 : i32
    return %arg0, %c0_i32 : i32, i32
  }
}

</mosaic_0001>

<bundles_post_ra>
// kernel: tile.28
= control target key start
LH: loop header
LB: loop body
LE: loop exit
PB: predicated region body
PF: predicated region fallthrough
CT: control target
= control target key end

     0   :  { %s22_s0 = inlined_call_operand.vmem [shape: f32[2], index: 0, kind: input, shape index: {}]   ;;  %s23_s1 = inlined_call_operand.vmem [shape: f32[4,2], index: 1, kind: output, shape index: {}]  }
   0x1   :  { %v4_v0 = vld [vmem:[%s22_s0] ss:$0 sm:$0xff] }
   0x2   :  { %5 = vst [vmem:[%s23_s1] sm:$0xf] %v4_v0 }

// kernel: mul.91
= control target key start
LH: loop header
LB: loop body
LE: loop exit
PB: predicated region body
PF: predicated region fallthrough
CT: control target
= control target key end

     0   :  { %vm7_vm0 = vcmask 15360   ;;  %s37_s8 = smov 2   ;;  %s38_s9 = smov 4   ;;  %vm13_vm1 = vcmask 64560   ;;  %vm19_vm2 = vcmask 48160   ;;  %vm25_vm3 = vcmask 31760   ;;  %s55_s0 = inlined_call_operand.vmem [shape: f32[4,2], index: 0, kind: input, shape index: {}]   ;;  %s56_s1 = inlined_call_operand.vmem [shape: f32[8], index: 1, kind: output, shape index: {}]  }
   0x1   :  { %v4_v0 = vld [vmem:[%s55_s0] sm:$0xf]  ;;  %s36_s0 = smov 6  }
   0x2   :  { %5 = vst [vmem:[#allocation1] sm:$0xf] %v4_v0 }
   0x9   :  { %v10_v1 = vld [vmem:[#allocation1 + $0x3] sm:$0x1]   ;;  %v22_v2 = vld [vmem:[#allocation1 + $0x1] sm:$0x1]   ;;  %v6_v3 = vld [vmem:[#allocation1] sm:$0x1]  }
   0xa   :  { %11 = vrot.lane.b32.xlu0 %v10_v1, %s36_s0  ;;  %23 = vrot.lane.b32.xlu1 %v22_v2, %s37_s8  ;;  %v16_v4 = vld [vmem:[#allocation1 + $0x2] sm:$0x1]   ;;  %8 = vst.msk [vmem:[#allocation0] sm:$0x1] %vm7_vm0, %v6_v3  }
   0xe   :  { %17 = vrot.lane.b32.xlu0 %v16_v4, %s38_s9 }
  0x7c   :  { %v12_v5 = vpop.permute.xlu0 %11   ;;  %v24_v6 = vpop.permute.xlu1 %23  }
  0x7d   :  { %14 = vst.msk [vmem:[#allocation0] sm:$0x1] %vm13_vm1, %v12_v5  }
  0x80   :  { %v18_v7 = vpop.permute.xlu0 %17  }
  0x81   :  { %20 = vst.msk [vmem:[#allocation0] sm:$0x1] %vm19_vm2, %v18_v7  }
  0x82   :  { %26 = vst.msk [vmem:[#allocation0] sm:$0x1] %vm25_vm3, %v24_v6  }
  0x89   :  { %v30_v8 = vld [vmem:[#allocation0] sm:$0x1] }
  0x8a   :  { %32 = vst [vmem:[%s56_s1] sm:$0x1] %v30_v8 }

// kernel: tile.43
= control target key start
LH: loop header
LB: loop body
LE: loop exit
PB: predicated region body
PF: predicated region fallthrough
CT: control target
= control target key end

     0   :  { %s64_s0 = inlined_call_operand.vmem [shape: f32[4], index: 0, kind: input, shape index: {}]   ;;  %s65_s1 = inlined_call_operand.vmem [shape: f32[64,4], index: 1, kind: output, shape index: {}]  }
   0x1   :  { %v4_v0 = vld [vmem:[%s64_s0] ss:$0 sm:$0xff] }
   0x2   :  { %5 = vst [vmem:[%s65_s1] sm:$0xff] %v4_v0  ;;  %20 = vst [vmem:[%s65_s1 + $0x8] sm:$0xff] %v4_v0 }
   0x3   :  { %21 = vst [vmem:[%s65_s1 + $0x10] sm:$0xff] %v4_v0  ;;  %22 = vst [vmem:[%s65_s1 + $0x18] sm:$0xff] %v4_v0 }
   0x4   :  { %23 = vst [vmem:[%s65_s1 + $0x20] sm:$0xff] %v4_v0  ;;  %24 = vst [vmem:[%s65_s1 + $0x28] sm:$0xff] %v4_v0 }
   0x5   :  { %25 = vst [vmem:[%s65_s1 + $0x30] sm:$0xff] %v4_v0  ;;  %26 = vst [vmem:[%s65_s1 + $0x38] sm:$0xff] %v4_v0 }

// kernel: tile.44
= control target key start
LH: loop header
LB: loop body
LE: loop exit
PB: predicated region body
PF: predicated region fallthrough
CT: control target
= control target key end

     0   :  { %vm5_vm0 = vcmask 1041409   ;;  %s425_s14 = smov 124   ;;  %s426_s21 = smov 116   ;;  %vm7_vm1 = vcmask 31744   ;;  %vm17_vm2 = vcmask 1048544   ;;  %vm27_vm3 = vcmask 1015744   ;;  %s696_s0 = inlined_call_operand.vmem [shape: f32[64,4], index: 0, kind: input, shape index: {}]   ;;  %s697_s1 = inlined_call_operand.vmem [shape: f32[1,256], index: 1, kind: output, shape index: {}]  }
   0x1   :  { %v331_v0 = vld [vmem:[%s696_s0 + $0x1f] sm:$0x1]   ;;  %v335_v3 = vld [vmem:[%s696_s0 + $0x1d] sm:$0x1]   ;;  %v333_v6 = vld [vmem:[%s696_s0 + $0x1e] sm:$0x1]  }
   0x2   :  { %v332_v1 = vld [vmem:[%s696_s0 + $0x3e] sm:$0x2]   ;;  %v336_v4 = vld [vmem:[%s696_s0 + $0x3c] sm:$0x2]   ;;  %v334_v7 = vld [vmem:[%s696_s0 + $0x3d] sm:$0x2]  }
   0x3   :  { %v14_v2 = vsel %vm5_vm0, %v332_v1, %v331_v0  ;;  %v34_v5 = vsel %vm5_vm0, %v336_v4, %v335_v3  ;;  %v337_v8 = vld [vmem:[%s696_s0 + $0x1c] sm:$0x1]   ;;  %v24_v9 = vsel %vm5_vm0, %v334_v7, %v333_v6  ;;  %v339_v12 = vld [vmem:[%s696_s0 + $0x1b] sm:$0x1]   ;;  %v341_v14 = vld [vmem:[%s696_s0 + $0x1a] sm:$0x1]  }
   0x4   :  { %15 = vrot.lane.b32.xlu0 %v14_v2, %s425_s14  ;;  %35 = vrot.lane.b32.xlu1 %v34_v5, %s426_s21  ;;  %v338_v10 = vld [vmem:[%s696_s0 + $0x3b] sm:$0x2]   ;;  %v340_v13 = vld [vmem:[%s696_s0 + $0x3a] sm:$0x2]   ;;  %s427_s3 = smov 120   ;;  %s428_s4 = smov 112  }
   0x5   :  { %v44_v11 = vsel %vm5_vm0, %v338_v10, %v337_v8  ;;  %v342_v15 = vld [vmem:[%s696_s0 + $0x39] sm:$0x2]   ;;  %v54_v16 = vsel %vm5_vm0, %v340_v13, %v339_v12  ;;  %v343_v18 = vld [vmem:[%s696_s0 + $0x19] sm:$0x1]   ;;  %v345_v20 = vld [vmem:[%s696_s0 + $0x18] sm:$0x1]  }
   0x6   :  { %v64_v17 = vsel %vm5_vm0, %v342_v15, %v341_v14  ;;  %v344_v19 = vld [vmem:[%s696_s0 + $0x38] sm:$0x2]   ;;  %v346_v21 = vld [vmem:[%s696_s0 + $0x37] sm:$0x2]   ;;  %s429_s13 = smov 108   ;;  %s430_s14 = smov 104  }
   0x7   :  { %v74_v22 = vsel %vm5_vm0, %v344_v19, %v343_v18  ;;  %v84_v23 = vsel %vm5_vm0, %v346_v21, %v345_v20  ;;  %v347_v24 = vld [vmem:[%s696_s0 + $0x17] sm:$0x1]   ;;  %v349_v26 = vld [vmem:[%s696_s0 + $0x16] sm:$0x1]   ;;  %s431_s23 = smov 100   ;;  %s432_s24 = smov 96  }
   0x8   :  { %25 = vrot.lane.b32.xlu0 %v24_v9, %s427_s3  ;;  %45 = vrot.lane.b32.xlu1 %v44_v11, %s428_s4  ;;  %v348_v25 = vld [vmem:[%s696_s0 + $0x36] sm:$0x2]   ;;  %v350_v27 = vld [vmem:[%s696_s0 + $0x35] sm:$0x2]   ;;  %s433_s4 = smov 92   ;;  %s434_s5 = smov 88  }
   0x9   :  { %v94_v28 = vsel %vm5_vm0, %v348_v25, %v347_v24  ;;  %v104_v29 = vsel %vm5_vm0, %v350_v27, %v349_v26  ;;  %v351_v30 = vld [vmem:[%s696_s0 + $0x15] sm:$0x1]   ;;  %v353_v32 = vld [vmem:[%s696_s0 + $0x14] sm:$0x1]   ;;  %v355_v36 = vld [vmem:[%s696_s0 + $0x13] sm:$0x1]  }
   0xa   :  { %v352_v31 = vld [vmem:[%s696_s0 + $0x34] sm:$0x2]   ;;  %v354_v33 = vld [vmem:[%s696_s0 + $0x33] sm:$0x2]   ;;  %v356_v37 = vld [vmem:[%s696_s0 + $0x32] sm:$0x2]  }
   0xb   :  { %v114_v34 = vsel %vm5_vm0, %v352_v31, %v351_v30  ;;  %v124_v35 = vsel %vm5_vm0, %v354_v33, %v353_v32  ;;  %v357_v38 = vld [vmem:[%s696_s0 + $0x12] sm:$0x1]   ;;  %s436_s15 = smov 80   ;;  %v134_v40 = vsel %vm5_vm0, %v356_v37, %v355_v36  ;;  %v359_v42 = vld [vmem:[%s696_s0 + $0x11] sm:$0x1]   ;;  %s438_s29 = smov 72  }
   0xc   :  { %55 = vrot.lane.b32.xlu0 %v54_v16, %s429_s13  ;;  %65 = vrot.lane.b32.xlu1 %v64_v17, %s430_s14  ;;  %v358_v39 = vld [vmem:[%s696_s0 + $0x31] sm:$0x2]   ;;  %s435_s14 = smov 84   ;;  %v360_v43 = vld [vmem:[%s696_s0 + $0x30] sm:$0x2]   ;;  %s439_s9 = smov 68  }
   0xd   :  { %v144_v41 = vsel %vm5_vm0, %v358_v39, %v357_v38  ;;  %v361_v44 = vld [vmem:[%s696_s0 + $0x10] sm:$0x1]   ;;  %v2_v46 = vld [vmem:[%s696_s0] sm:$0x1]   ;;  %v154_v48 = vsel %vm5_vm0, %v360_v43, %v359_v42  ;;  %v363_v51 = vld [vmem:[%s696_s0 + $0xf] sm:$0x1]  }
   0xe   :  { %v362_v45 = vld [vmem:[%s696_s0 + $0x2f] sm:$0x2]   ;;  %v330_v47 = vld [vmem:[%s696_s0 + $0x1f] sm:$0x2]   ;;  %v364_v52 = vld [vmem:[%s696_s0 + $0x2e] sm:$0x2]  }
   0xf   :  { %v6_v49 = vsel %vm5_vm0, %v330_v47, %v2_v46  ;;  %v164_v50 = vsel %vm5_vm0, %v362_v45, %v361_v44  ;;  %v365_v53 = vld [vmem:[%s696_s0 + $0xe] sm:$0x1]   ;;  %s440_s10 = smov 64   ;;  %v174_v55 = vsel %vm5_vm0, %v364_v52, %v363_v51  ;;  %v367_v57 = vld [vmem:[%s696_s0 + $0xd] sm:$0x1]   ;;  %s441_s19 = smov 60  }
  0x10   :  { %75 = vrot.lane.b32.xlu0 %v74_v22, %s431_s23  ;;  %85 = vrot.lane.b32.xlu1 %v84_v23, %s432_s24  ;;  %s437_s24 = smov 76   ;;  %8 = vst.msk [vmem:[#allocation0] ss:$8 sm:$0x3] %vm7_vm1, %v6_v49   ;;  %v366_v54 = vld [vmem:[%s696_s0 + $0x2d] sm:$0x2]  }
  0x11   :  { %v184_v56 = vsel %vm5_vm0, %v366_v54, %v365_v53  ;;  %v368_v58 = vld [vmem:[%s696_s0 + $0x2c] sm:$0x2]   ;;  %v369_v59 = vld [vmem:[%s696_s0 + $0xc] sm:$0x1]   ;;  %s442_s20 = smov 56   ;;  %s444_s30 = smov 48  }
  0x12   :  { %v370_v60 = vld [vmem:[%s696_s0 + $0x2b] sm:$0x2]   ;;  %v194_v61 = vsel %vm5_vm0, %v368_v58, %v367_v57  ;;  %v371_v63 = vld [vmem:[%s696_s0 + $0xb] sm:$0x1]   ;;  %v373_v1 = vld [vmem:[%s696_s0 + $0xa] sm:$0x1]  }
  0x13   :  { %v204_v62 = vsel %vm5_vm0, %v370_v60, %v369_v59  ;;  %v372_v0 = vld [vmem:[%s696_s0 + $0x2a] sm:$0x2]   ;;  %v374_v2 = vld [vmem:[%s696_s0 + $0x29] sm:$0x2]   ;;  %v375_v5 = vld [vmem:[%s696_s0 + $0x9] sm:$0x1]  }
  0x14   :  { %95 = vrot.lane.b32.xlu0 %v94_v28, %s433_s4  ;;  %105 = vrot.lane.b32.xlu1 %v104_v29, %s434_s5  ;;  %v214_v3 = vsel %vm5_vm0, %v372_v0, %v371_v63  ;;  %v224_v4 = vsel %vm5_vm0, %v374_v2, %v373_v1  ;;  %v376_v6 = vld [vmem:[%s696_s0 + $0x28] sm:$0x2]   ;;  %v377_v7 = vld [vmem:[%s696_s0 + $0x8] sm:$0x1]   ;;  %s446_s11 = smov 40   ;;  %s448_s21 = smov 32  }
  0x15   :  { %v378_v8 = vld [vmem:[%s696_s0 + $0x27] sm:$0x2]   ;;  %v234_v9 = vsel %vm5_vm0, %v376_v6, %v375_v5  ;;  %v379_v11 = vld [vmem:[%s696_s0 + $0x7] sm:$0x1]   ;;  %v381_v13 = vld [vmem:[%s696_s0 + $0x6] sm:$0x1]  }
  0x16   :  { %v244_v10 = vsel %vm5_vm0, %v378_v8, %v377_v7  ;;  %v380_v12 = vld [vmem:[%s696_s0 + $0x26] sm:$0x2]   ;;  %v382_v14 = vld [vmem:[%s696_s0 + $0x25] sm:$0x2]   ;;  %v383_v17 = vld [vmem:[%s696_s0 + $0x5] sm:$0x1]  }
  0x17   :  { %v254_v15 = vsel %vm5_vm0, %v380_v12, %v379_v11  ;;  %v264_v16 = vsel %vm5_vm0, %v382_v14, %v381_v13  ;;  %v384_v18 = vld [vmem:[%s696_s0 + $0x24] sm:$0x2]   ;;  %v385_v19 = vld [vmem:[%s696_s0 + $0x4] sm:$0x1]   ;;  %s450_s2 = smov 24   ;;  %s452_s12 = smov 16  }
  0x18   :  { %115 = vrot.lane.b32.xlu0 %v114_v34, %s435_s14  ;;  %125 = vrot.lane.b32.xlu1 %v124_v35, %s436_s15  ;;  %v386_v20 = vld [vmem:[%s696_s0 + $0x23] sm:$0x2]   ;;  %v274_v21 = vsel %vm5_vm0, %v384_v18, %v383_v17  ;;  %v387_v23 = vld [vmem:[%s696_s0 + $0x3] sm:$0x1]   ;;  %s454_s17 = smov 8   ;;  %s455_s18 = smov 4  }
  0x19   :  { %v284_v22 = vsel %vm5_vm0, %v386_v20, %v385_v19  ;;  %v388_v24 = vld [vmem:[%s696_s0 + $0x22] sm:$0x2]   ;;  %v389_v25 = vld [vmem:[%s696_s0 + $0x2] sm:$0x1]   ;;  %v391_v29 = vld [vmem:[%s696_s0 + $0x1] sm:$0x1]  }
  0x1a   :  { %v390_v26 = vld [vmem:[%s696_s0 + $0x21] sm:$0x2]   ;;  %v294_v27 = vsel %vm5_vm0, %v388_v24, %v387_v23  ;;  %v392_v30 = vld [vmem:[%s696_s0 + $0x20] sm:$0x2]   ;;  %s453_s0 = smov 12   ;;  %vm37_vm4 = vcmask 982944  }
  0x1b   :  { %v304_v28 = vsel %vm5_vm0, %v390_v26, %v389_v25  ;;  %v314_v31 = vsel %vm5_vm0, %v392_v30, %v391_v29  ;;  %vm47_vm5 = vcmask 950144   ;;  %vm57_vm6 = vcmask 917344  }
  0x1c   :  { %135 = vrot.lane.b32.xlu0 %v134_v40, %s437_s24  ;;  %145 = vrot.lane.b32.xlu1 %v144_v41, %s438_s29  ;;  %s443_s29 = smov 52   ;;  %vm67_vm7 = vcmask 884544   ;;  %vm77_vm8 = vcmask 851744   ;;  %vm87_vm9 = vcmask 818944   ;;  %vm97_vm10 = vcmask 786144  }
  0x1d   :  { %vm107_vm11 = vcmask 753344   ;;  %vm117_vm12 = vcmask 720544   ;;  %vm127_vm13 = vcmask 687744   ;;  %vm137_vm14 = vcmask 654944  }
  0x1e   :  { %vm147_vm15 = vcmask 622144   ;;  %vm157_vm0 = vcmask 589344   ;;  %vm167_vm1 = vcmask 556544  }
  0x20   :  { %155 = vrot.lane.b32.xlu0 %v154_v48, %s439_s9  ;;  %165 = vrot.lane.b32.xlu1 %v164_v50, %s440_s10  ;;  %s445_s10 = smov 44  }
  0x24   :  { %175 = vrot.lane.b32.xlu0 %v174_v55, %s441_s19  ;;  %185 = vrot.lane.b32.xlu1 %v184_v56, %s442_s20  ;;  %s447_s20 = smov 36  }
  0x28   :  { %195 = vrot.lane.b32.xlu0 %v194_v61, %s443_s29  ;;  %205 = vrot.lane.b32.xlu1 %v204_v62, %s444_s30  ;;  %s449_s30 = smov 28  }
  0x2c   :  { %215 = vrot.lane.b32.xlu0 %v214_v3, %s445_s10  ;;  %225 = vrot.lane.b32.xlu1 %v224_v4, %s446_s11  ;;  %s451_s11 = smov 20  }
  0x30   :  { %235 = vrot.lane.b32.xlu0 %v234_v9, %s447_s20  ;;  %245 = vrot.lane.b32.xlu1 %v244_v10, %s448_s21 }
  0x34   :  { %255 = vrot.lane.b32.xlu0 %v254_v15, %s449_s30  ;;  %265 = vrot.lane.b32.xlu1 %v264_v16, %s450_s2 }
  0x38   :  { %275 = vrot.lane.b32.xlu0 %v274_v21, %s451_s11  ;;  %285 = vrot.lane.b32.xlu1 %v284_v22, %s452_s12 }
  0x3c   :  { %295 = vrot.lane.b32.xlu0 %v294_v27, %s453_s0  ;;  %305 = vrot.lane.b32.xlu1 %v304_v28, %s454_s17 }
  0x40   :  { %315 = vrot.lane.b32.xlu0 %v314_v31, %s455_s18 }
  0x76   :  { %v16_v32 = vpop.permute.xlu0 %15   ;;  %v36_v33 = vpop.permute.xlu1 %35  }
  0x77   :  { %18 = vst.msk [vmem:[#allocation0] ss:$8 sm:$0x3] %vm17_vm2, %v16_v32   ;;  %vm177_vm2 = vcmask 523744  }
  0x7a   :  { %v26_v34 = vpop.permute.xlu0 %25   ;;  %v46_v35 = vpop.permute.xlu1 %45  }
  0x7b   :  { %28 = vst.msk [vmem:[#allocation0] ss:$8 sm:$0x3] %vm27_vm3, %v26_v34   ;;  %vm187_vm3 = vcmask 490944  }
  0x7c   :  { %38 = vst.msk [vmem:[#allocation0] ss:$8 sm:$0x3] %vm37_vm4, %v36_v33   ;;  %vm197_vm4 = vcmask 458144  }
  0x7d   :  { %48 = vst.msk [vmem:[#allocation0] ss:$8 sm:$0x3] %vm47_vm5, %v46_v35   ;;  %vm207_vm5 = vcmask 425344  }
  0x7e   :  { %v56_v36 = vpop.permute.xlu0 %55   ;;  %v66_v37 = vpop.permute.xlu1 %65  }
  0x7f   :  { %58 = vst.msk [vmem:[#allocation0] ss:$8 sm:$0x3] %vm57_vm6, %v56_v36   ;;  %vm217_vm6 = vcmask 392544  }
  0x80   :  { %68 = vst.msk [vmem:[#allocation0] ss:$8 sm:$0x3] %vm67_vm7, %v66_v37   ;;  %vm227_vm7 = vcmask 359744  }
  0x82   :  { %v76_v38 = vpop.permute.xlu0 %75   ;;  %v86_v39 = vpop.permute.xlu1 %85  }
  0x83   :  { %78 = vst.msk [vmem:[#allocation0] ss:$8 sm:$0x3] %vm77_vm8, %v76_v38   ;;  %vm237_vm8 = vcmask 326944  }
  0x84   :  { %88 = vst.msk [vmem:[#allocation0] ss:$8 sm:$0x3] %vm87_vm9, %v86_v39   ;;  %vm247_vm9 = vcmask 294144  }
  0x86   :  { %v96_v40 = vpop.permute.xlu0 %95   ;;  %v106_v41 = vpop.permute.xlu1 %105  }
  0x87   :  { %98 = vst.msk [vmem:[#allocation0] ss:$8 sm:$0x3] %vm97_vm10, %v96_v40   ;;  %vm257_vm10 = vcmask 261344  }
  0x88   :  { %108 = vst.msk [vmem:[#allocation0] ss:$8 sm:$0x3] %vm107_vm11, %v106_v41   ;;  %vm267_vm11 = vcmask 228544  }
  0x8a   :  { %v116_v42 = vpop.permute.xlu0 %115   ;;  %v126_v43 = vpop.permute.xlu1 %125  }
  0x8b   :  { %118 = vst.msk [vmem:[#allocation0] ss:$8 sm:$0x3] %vm117_vm12, %v116_v42   ;;  %vm277_vm12 = vcmask 195744  }
  0x8c   :  { %128 = vst.msk [vmem:[#allocation0] ss:$8 sm:$0x3] %vm127_vm13, %v126_v43   ;;  %vm287_vm13 = vcmask 162944  }
  0x8e   :  { %v136_v44 = vpop.permute.xlu0 %135   ;;  %v146_v45 = vpop.permute.xlu1 %145  }
  0x8f   :  { %138 = vst.msk [vmem:[#allocation0] ss:$8 sm:$0x3] %vm137_vm14, %v136_v44   ;;  %vm297_vm14 = vcmask 130144  }
  0x90   :  { %148 = vst.msk [vmem:[#allocation0] ss:$8 sm:$0x3] %vm147_vm15, %v146_v45   ;;  %vm307_vm15 = vcmask 97344  }
  0x92   :  { %v156_v46 = vpop.permute.xlu0 %155   ;;  %v166_v47 = vpop.permute.xlu1 %165  }
  0x93   :  { %158 = vst.msk [vmem:[#allocation0] ss:$8 sm:$0x3] %vm157_vm0, %v156_v46   ;;  %vm317_vm0 = vcmask 64544  }
  0x94   :  { %168 = vst.msk [vmem:[#allocation0] ss:$8 sm:$0x3] %vm167_vm1, %v166_v47  }
  0x96   :  { %v176_v48 = vpop.permute.xlu0 %175   ;;  %v186_v49 = vpop.permute.xlu1 %185  }
  0x97   :  { %178 = vst.msk [vmem:[#allocation0] ss:$8 sm:$0x3] %vm177_vm2, %v176_v48  }
  0x98   :  { %188 = vst.msk [vmem:[#allocation0] ss:$8 sm:$0x3] %vm187_vm3, %v186_v49  }
  0x9a   :  { %v196_v50 = vpop.permute.xlu0 %195   ;;  %v206_v51 = vpop.permute.xlu1 %205  }
  0x9b   :  { %198 = vst.msk [vmem:[#allocation0] ss:$8 sm:$0x3] %vm197_vm4, %v196_v50  }
  0x9c   :  { %208 = vst.msk [vmem:[#allocation0] ss:$8 sm:$0x3] %vm207_vm5, %v206_v51  }
  0x9e   :  { %v216_v52 = vpop.permute.xlu0 %215   ;;  %v226_v53 = vpop.permute.xlu1 %225  }
  0x9f   :  { %218 = vst.msk [vmem:[#allocation0] ss:$8 sm:$0x3] %vm217_vm6, %v216_v52  }
  0xa0   :  { %228 = vst.msk [vmem:[#allocation0] ss:$8 sm:$0x3] %vm227_vm7, %v226_v53  }
  0xa2   :  { %v236_v54 = vpop.permute.xlu0 %235   ;;  %v246_v55 = vpop.permute.xlu1 %245  }
  0xa3   :  { %238 = vst.msk [vmem:[#allocation0] ss:$8 sm:$0x3] %vm237_vm8, %v236_v54  }
  0xa4   :  { %248 = vst.msk [vmem:[#allocation0] ss:$8 sm:$0x3] %vm247_vm9, %v246_v55  }
  0xa6   :  { %v256_v56 = vpop.permute.xlu0 %255   ;;  %v266_v57 = vpop.permute.xlu1 %265  }
  0xa7   :  { %258 = vst.msk [vmem:[#allocation0] ss:$8 sm:$0x3] %vm257_vm10, %v256_v56  }
  0xa8   :  { %268 = vst.msk [vmem:[#allocation0] ss:$8 sm:$0x3] %vm267_vm11, %v266_v57  }
  0xaa   :  { %v276_v58 = vpop.permute.xlu0 %275   ;;  %v286_v59 = vpop.permute.xlu1 %285  }
  0xab   :  { %278 = vst.msk [vmem:[#allocation0] ss:$8 sm:$0x3] %vm277_vm12, %v276_v58  }
  0xac   :  { %288 = vst.msk [vmem:[#allocation0] ss:$8 sm:$0x3] %vm287_vm13, %v286_v59  }
  0xae   :  { %v296_v60 = vpop.permute.xlu0 %295   ;;  %v306_v61 = vpop.permute.xlu1 %305  }
  0xaf   :  { %298 = vst.msk [vmem:[#allocation0] ss:$8 sm:$0x3] %vm297_vm14, %v296_v60  }
  0xb0   :  { %308 = vst.msk [vmem:[#allocation0] ss:$8 sm:$0x3] %vm307_vm15, %v306_v61  }
  0xb2   :  { %v316_v62 = vpop.permute.xlu0 %315  }
  0xb3   :  { %318 = vst.msk [vmem:[#allocation0] ss:$8 sm:$0x3] %vm317_vm0, %v316_v62  }
  0xba   :  { %v322_v63 = vld [vmem:[#allocation0] sm:$0x1]  ;;  %v326_v0 = vld [vmem:[#allocation0 + $0x8] sm:$0x1] }
  0xbb   :  { %324 = vst [vmem:[%s697_s1] sm:$0x1] %v322_v63  ;;  %393 = vst [vmem:[%s697_s1 + $0x1] sm:$0x1] %v326_v0 }

// kernel: tile.38
= control target key start
LH: loop header
LB: loop body
LE: loop exit
PB: predicated region body
PF: predicated region fallthrough
CT: control target
= control target key end

     0   :  { %s64_s0 = inlined_call_operand.vmem [shape: f32[2], index: 0, kind: input, shape index: {}]   ;;  %s65_s1 = inlined_call_operand.vmem [shape: f32[64,2], index: 1, kind: output, shape index: {}]  }
   0x1   :  { %v4_v0 = vld [vmem:[%s64_s0] ss:$0 sm:$0xff] }
   0x2   :  { %5 = vst [vmem:[%s65_s1] sm:$0xff] %v4_v0  ;;  %20 = vst [vmem:[%s65_s1 + $0x8] sm:$0xff] %v4_v0 }
   0x3   :  { %21 = vst [vmem:[%s65_s1 + $0x10] sm:$0xff] %v4_v0  ;;  %22 = vst [vmem:[%s65_s1 + $0x18] sm:$0xff] %v4_v0 }
   0x4   :  { %23 = vst [vmem:[%s65_s1 + $0x20] sm:$0xff] %v4_v0  ;;  %24 = vst [vmem:[%s65_s1 + $0x28] sm:$0xff] %v4_v0 }
   0x5   :  { %25 = vst [vmem:[%s65_s1 + $0x30] sm:$0xff] %v4_v0  ;;  %26 = vst [vmem:[%s65_s1 + $0x38] sm:$0xff] %v4_v0 }

// kernel: tile.39
= control target key start
LH: loop header
LB: loop body
LE: loop exit
PB: predicated region body
PF: predicated region fallthrough
CT: control target
= control target key end

     0   :  { %s515_s10 = smov 126   ;;  %s516_s11 = smov 122   ;;  %vm3_vm0 = vcmask 15360   ;;  %vm9_vm1 = vcmask 1048560   ;;  %vm21_vm2 = vcmask 1015760   ;;  %vm15_vm3 = vcmask 1032160   ;;  %s783_s0 = inlined_call_operand.vmem [shape: f32[64,2], index: 0, kind: input, shape index: {}]   ;;  %s784_s1 = inlined_call_operand.vmem [shape: f32[1,128], index: 1, kind: output, shape index: {}]  }
   0x1   :  { %v389_v0 = vld [vmem:[%s783_s0 + $0x3f] sm:$0x1]   ;;  %v391_v1 = vld [vmem:[%s783_s0 + $0x3d] sm:$0x1]   ;;  %v390_v2 = vld [vmem:[%s783_s0 + $0x3e] sm:$0x1]  }
   0x2   :  { %7 = vrot.lane.b32.xlu0 %v389_v0, %s515_s10  ;;  %19 = vrot.lane.b32.xlu1 %v391_v1, %s516_s11  ;;  %v392_v3 = vld [vmem:[%s783_s0 + $0x3c] sm:$0x1]   ;;  %s517_s16 = smov 124   ;;  %s518_s17 = smov 120   ;;  %v393_v4 = vld [vmem:[%s783_s0 + $0x3b] sm:$0x1]  }
   0x3   :  { %v394_v5 = vld [vmem:[%s783_s0 + $0x3a] sm:$0x1]   ;;  %s519_s22 = smov 118   ;;  %s520_s23 = smov 116   ;;  %v395_v6 = vld [vmem:[%s783_s0 + $0x39] sm:$0x1]  }
   0x4   :  { %v396_v7 = vld [vmem:[%s783_s0 + $0x38] sm:$0x1]   ;;  %s521_s28 = smov 114   ;;  %s522_s29 = smov 112   ;;  %v397_v8 = vld [vmem:[%s783_s0 + $0x37] sm:$0x1]  }
   0x5   :  { %v398_v9 = vld [vmem:[%s783_s0 + $0x36] sm:$0x1]   ;;  %s523_s5 = smov 110   ;;  %s524_s6 = smov 108   ;;  %v399_v10 = vld [vmem:[%s783_s0 + $0x35] sm:$0x1]  }
   0x6   :  { %13 = vrot.lane.b32.xlu0 %v390_v2, %s517_s16  ;;  %25 = vrot.lane.b32.xlu1 %v392_v3, %s518_s17  ;;  %v400_v11 = vld [vmem:[%s783_s0 + $0x34] sm:$0x1]   ;;  %s525_s11 = smov 106   ;;  %s526_s12 = smov 104   ;;  %v401_v12 = vld [vmem:[%s783_s0 + $0x33] sm:$0x1]  }
   0x7   :  { %v402_v13 = vld [vmem:[%s783_s0 + $0x32] sm:$0x1]   ;;  %s527_s17 = smov 102   ;;  %s528_s18 = smov 100   ;;  %v403_v14 = vld [vmem:[%s783_s0 + $0x31] sm:$0x1]  }
   0x8   :  { %v404_v15 = vld [vmem:[%s783_s0 + $0x30] sm:$0x1]   ;;  %v2_v16 = vld [vmem:[%s783_s0] sm:$0x1]   ;;  %s529_s25 = smov 98   ;;  %s530_s26 = smov 96  }
   0x9   :  { %v405_v17 = vld [vmem:[%s783_s0 + $0x2f] sm:$0x1]   ;;  %v406_v18 = vld [vmem:[%s783_s0 + $0x2e] sm:$0x1]   ;;  %4 = vst.msk [vmem:[#allocation0] sm:$0x1] %vm3_vm0, %v2_v16  }
   0xa   :  { %31 = vrot.lane.b32.xlu0 %v393_v4, %s519_s22  ;;  %37 = vrot.lane.b32.xlu1 %v394_v5, %s520_s23  ;;  %s531_s2 = smov 94   ;;  %s532_s3 = smov 92   ;;  %v407_v19 = vld [vmem:[%s783_s0 + $0x2d] sm:$0x1]   ;;  %v408_v20 = vld [vmem:[%s783_s0 + $0x2c] sm:$0x1]  }
   0xb   :  { %s533_s8 = smov 90   ;;  %s534_s9 = smov 88   ;;  %v409_v21 = vld [vmem:[%s783_s0 + $0x2b] sm:$0x1]   ;;  %v410_v22 = vld [vmem:[%s783_s0 + $0x2a] sm:$0x1]  }
   0xc   :  { %s535_s14 = smov 86   ;;  %s536_s15 = smov 84   ;;  %v411_v23 = vld [vmem:[%s783_s0 + $0x29] sm:$0x1]   ;;  %v412_v24 = vld [vmem:[%s783_s0 + $0x28] sm:$0x1]  }
   0xd   :  { %s537_s20 = smov 82   ;;  %s538_s21 = smov 80   ;;  %v413_v25 = vld [vmem:[%s783_s0 + $0x27] sm:$0x1]   ;;  %v414_v26 = vld [vmem:[%s783_s0 + $0x26] sm:$0x1]  }
   0xe   :  { %43 = vrot.lane.b32.xlu0 %v395_v6, %s521_s28  ;;  %49 = vrot.lane.b32.xlu1 %v396_v7, %s522_s29  ;;  %s540_s27 = smov 76   ;;  %v415_v27 = vld [vmem:[%s783_s0 + $0x25] sm:$0x1]   ;;  %v416_v28 = vld [vmem:[%s783_s0 + $0x24] sm:$0x1]   ;;  %s542_s4 = smov 72  }
   0xf   :  { %v417_v29 = vld [vmem:[%s783_s0 + $0x23] sm:$0x1]   ;;  %v418_v30 = vld [vmem:[%s783_s0 + $0x22] sm:$0x1]   ;;  %s544_s10 = smov 68   ;;  %s546_s16 = smov 64  }
  0x10   :  { %v419_v31 = vld [vmem:[%s783_s0 + $0x21] sm:$0x1]   ;;  %v420_v32 = vld [vmem:[%s783_s0 + $0x20] sm:$0x1]   ;;  %v421_v33 = vld [vmem:[%s783_s0 + $0x1f] sm:$0x1]  }
  0x11   :  { %v422_v34 = vld [vmem:[%s783_s0 + $0x1e] sm:$0x1]   ;;  %s548_s22 = smov 60   ;;  %v423_v35 = vld [vmem:[%s783_s0 + $0x1d] sm:$0x1]   ;;  %s550_s28 = smov 56  }
  0x12   :  { %55 = vrot.lane.b32.xlu0 %v397_v8, %s523_s5  ;;  %61 = vrot.lane.b32.xlu1 %v398_v9, %s524_s6  ;;  %v424_v36 = vld [vmem:[%s783_s0 + $0x1c] sm:$0x1]   ;;  %v425_v37 = vld [vmem:[%s783_s0 + $0x1b] sm:$0x1]   ;;  %s552_s5 = smov 52   ;;  %s558_s23 = smov 40  }
  0x13   :  { %v426_v38 = vld [vmem:[%s783_s0 + $0x1a] sm:$0x1]   ;;  %v427_v39 = vld [vmem:[%s783_s0 + $0x19] sm:$0x1]   ;;  %v428_v40 = vld [vmem:[%s783_s0 + $0x18] sm:$0x1]  }
  0x14   :  { %v429_v41 = vld [vmem:[%s783_s0 + $0x17] sm:$0x1]   ;;  %v430_v42 = vld [vmem:[%s783_s0 + $0x16] sm:$0x1]   ;;  %v431_v43 = vld [vmem:[%s783_s0 + $0x15] sm:$0x1]  }
  0x15   :  { %v432_v44 = vld [vmem:[%s783_s0 + $0x14] sm:$0x1]   ;;  %v433_v45 = vld [vmem:[%s783_s0 + $0x13] sm:$0x1]   ;;  %v434_v46 = vld [vmem:[%s783_s0 + $0x12] sm:$0x1]  }
  0x16   :  { %67 = vrot.lane.b32.xlu0 %v399_v10, %s525_s11  ;;  %73 = vrot.lane.b32.xlu1 %v400_v11, %s526_s12  ;;  %s554_s11 = smov 48   ;;  %s560_s29 = smov 36   ;;  %v435_v47 = vld [vmem:[%s783_s0 + $0x11] sm:$0x1]   ;;  %v436_v48 = vld [vmem:[%s783_s0 + $0x10] sm:$0x1]  }
  0x17   :  { %s562_s6 = smov 32   ;;  %v437_v49 = vld [vmem:[%s783_s0 + $0xf] sm:$0x1]   ;;  %v438_v50 = vld [vmem:[%s783_s0 + $0xe] sm:$0x1]   ;;  %s564_s12 = smov 28  }
  0x18   :  { %v439_v51 = vld [vmem:[%s783_s0 + $0xd] sm:$0x1]   ;;  %v440_v52 = vld [vmem:[%s783_s0 + $0xc] sm:$0x1]   ;;  %v441_v53 = vld [vmem:[%s783_s0 + $0xb] sm:$0x1]  }
  0x19   :  { %v442_v54 = vld [vmem:[%s783_s0 + $0xa] sm:$0x1]   ;;  %s568_s24 = smov 20   ;;  %v443_v55 = vld [vmem:[%s783_s0 + $0x9] sm:$0x1]   ;;  %s570_s30 = smov 16  }
  0x1a   :  { %79 = vrot.lane.b32.xlu0 %v401_v12, %s527_s17  ;;  %85 = vrot.lane.b32.xlu1 %v402_v13, %s528_s18  ;;  %s556_s17 = smov 44   ;;  %s566_s18 = smov 24   ;;  %v444_v56 = vld [vmem:[%s783_s0 + $0x8] sm:$0x1]   ;;  %v445_v57 = vld [vmem:[%s783_s0 + $0x7] sm:$0x1]  }
  0x1b   :  { %v446_v58 = vld [vmem:[%s783_s0 + $0x6] sm:$0x1]   ;;  %s572_s7 = smov 12   ;;  %v447_v59 = vld [vmem:[%s783_s0 + $0x5] sm:$0x1]   ;;  %s574_s13 = smov 8  }
  0x1c   :  { %v448_v60 = vld [vmem:[%s783_s0 + $0x4] sm:$0x1]   ;;  %v449_v63 = vld [vmem:[%s783_s0 + $0x3] sm:$0x1]   ;;  %v450_v0 = vld [vmem:[%s783_s0 + $0x2] sm:$0x1]  }
  0x1d   :  { %vm27_vm4 = vcmask 999360   ;;  %vm33_vm5 = vcmask 982960   ;;  %s576_s19 = smov 4   ;;  %v451_v3 = vld [vmem:[%s783_s0 + $0x1] sm:$0x1]   ;;  %vm39_vm6 = vcmask 966560  }
  0x1e   :  { %91 = vrot.lane.b32.xlu0 %v403_v14, %s529_s25  ;;  %97 = vrot.lane.b32.xlu1 %v404_v15, %s530_s26  ;;  %s539_s26 = smov 78   ;;  %s577_s0 = smov 2   ;;  %vm45_vm7 = vcmask 950160   ;;  %vm51_vm8 = vcmask 933760   ;;  %vm57_vm9 = vcmask 917360   ;;  %vm63_vm10 = vcmask 900960  }
  0x1f   :  { %vm69_vm11 = vcmask 884560   ;;  %vm75_vm12 = vcmask 868160   ;;  %vm81_vm13 = vcmask 851760   ;;  %vm87_vm14 = vcmask 835360  }
  0x20   :  { %vm93_vm15 = vcmask 818960   ;;  %vm99_vm0 = vcmask 802560  }
  0x22   :  { %103 = vrot.lane.b32.xlu0 %v405_v17, %s531_s2  ;;  %109 = vrot.lane.b32.xlu1 %v406_v18, %s532_s3  ;;  %s541_s3 = smov 74  }
  0x26   :  { %115 = vrot.lane.b32.xlu0 %v407_v19, %s533_s8  ;;  %121 = vrot.lane.b32.xlu1 %v408_v20, %s534_s9  ;;  %s543_s9 = smov 70  }
  0x2a   :  { %127 = vrot.lane.b32.xlu0 %v409_v21, %s535_s14  ;;  %133 = vrot.lane.b32.xlu1 %v410_v22, %s536_s15  ;;  %s545_s15 = smov 66  }
  0x2e   :  { %139 = vrot.lane.b32.xlu0 %v411_v23, %s537_s20  ;;  %145 = vrot.lane.b32.xlu1 %v412_v24, %s538_s21  ;;  %s547_s21 = smov 62  }
  0x32   :  { %151 = vrot.lane.b32.xlu0 %v413_v25, %s539_s26  ;;  %157 = vrot.lane.b32.xlu1 %v414_v26, %s540_s27  ;;  %s549_s27 = smov 58  }
  0x36   :  { %163 = vrot.lane.b32.xlu0 %v415_v27, %s541_s3  ;;  %169 = vrot.lane.b32.xlu1 %v416_v28, %s542_s4  ;;  %s551_s4 = smov 54  }
  0x3a   :  { %175 = vrot.lane.b32.xlu0 %v417_v29, %s543_s9  ;;  %181 = vrot.lane.b32.xlu1 %v418_v30, %s544_s10  ;;  %s553_s10 = smov 50  }
  0x3e   :  { %187 = vrot.lane.b32.xlu0 %v419_v31, %s545_s15  ;;  %193 = vrot.lane.b32.xlu1 %v420_v32, %s546_s16  ;;  %s555_s16 = smov 46  }
  0x42   :  { %199 = vrot.lane.b32.xlu0 %v421_v33, %s547_s21  ;;  %205 = vrot.lane.b32.xlu1 %v422_v34, %s548_s22  ;;  %s557_s22 = smov 42  }
  0x46   :  { %211 = vrot.lane.b32.xlu0 %v423_v35, %s549_s27  ;;  %217 = vrot.lane.b32.xlu1 %v424_v36, %s550_s28  ;;  %s559_s28 = smov 38  }
  0x4a   :  { %223 = vrot.lane.b32.xlu0 %v425_v37, %s551_s4  ;;  %229 = vrot.lane.b32.xlu1 %v426_v38, %s552_s5  ;;  %s561_s5 = smov 34  }
  0x4e   :  { %235 = vrot.lane.b32.xlu0 %v427_v39, %s553_s10  ;;  %241 = vrot.lane.b32.xlu1 %v428_v40, %s554_s11  ;;  %s563_s11 = smov 30  }
  0x52   :  { %247 = vrot.lane.b32.xlu0 %v429_v41, %s555_s16  ;;  %253 = vrot.lane.b32.xlu1 %v430_v42, %s556_s17  ;;  %s565_s17 = smov 26  }
  0x56   :  { %259 = vrot.lane.b32.xlu0 %v431_v43, %s557_s22  ;;  %265 = vrot.lane.b32.xlu1 %v432_v44, %s558_s23  ;;  %s567_s23 = smov 22  }
  0x5a   :  { %271 = vrot.lane.b32.xlu0 %v433_v45, %s559_s28  ;;  %277 = vrot.lane.b32.xlu1 %v434_v46, %s560_s29  ;;  %s569_s29 = smov 18  }
  0x5e   :  { %283 = vrot.lane.b32.xlu0 %v435_v47, %s561_s5  ;;  %289 = vrot.lane.b32.xlu1 %v436_v48, %s562_s6  ;;  %s571_s6 = smov 14  }
  0x62   :  { %295 = vrot.lane.b32.xlu0 %v437_v49, %s563_s11  ;;  %301 = vrot.lane.b32.xlu1 %v438_v50, %s564_s12  ;;  %s573_s12 = smov 10  }
  0x66   :  { %307 = vrot.lane.b32.xlu0 %v439_v51, %s565_s17  ;;  %313 = vrot.lane.b32.xlu1 %v440_v52, %s566_s18  ;;  %s575_s18 = smov 6  }
  0x6a   :  { %319 = vrot.lane.b32.xlu0 %v441_v53, %s567_s23  ;;  %325 = vrot.lane.b32.xlu1 %v442_v54, %s568_s24 }
  0x6e   :  { %331 = vrot.lane.b32.xlu0 %v443_v55, %s569_s29  ;;  %337 = vrot.lane.b32.xlu1 %v444_v56, %s570_s30 }
  0x72   :  { %343 = vrot.lane.b32.xlu0 %v445_v57, %s571_s6  ;;  %349 = vrot.lane.b32.xlu1 %v446_v58, %s572_s7 }
  0x74   :  { %v8_v61 = vpop.permute.xlu0 %7   ;;  %v20_v62 = vpop.permute.xlu1 %19  }
  0x75   :  { %10 = vst.msk [vmem:[#allocation0] sm:$0x1] %vm9_vm1, %v8_v61   ;;  %vm105_vm1 = vcmask 786160  }
  0x76   :  { %355 = vrot.lane.b32.xlu0 %v447_v59, %s573_s12  ;;  %361 = vrot.lane.b32.xlu1 %v448_v60, %s574_s13 }
  0x78   :  { %v14_v1 = vpop.permute.xlu0 %13   ;;  %v26_v2 = vpop.permute.xlu1 %25  }
  0x79   :  { %16 = vst.msk [vmem:[#allocation0] sm:$0x1] %vm15_vm3, %v14_v1   ;;  %vm117_vm3 = vcmask 753360  }
  0x7a   :  { %22 = vst.msk [vmem:[#allocation0] sm:$0x1] %vm21_vm2, %v20_v62   ;;  %367 = vrot.lane.b32.xlu0 %v449_v63, %s575_s18  ;;  %373 = vrot.lane.b32.xlu1 %v450_v0, %s576_s19  ;;  %vm111_vm2 = vcmask 769760  }
  0x7b   :  { %28 = vst.msk [vmem:[#allocation0] sm:$0x1] %vm27_vm4, %v26_v2   ;;  %vm123_vm4 = vcmask 736960  }
  0x7c   :  { %v32_v4 = vpop.permute.xlu0 %31   ;;  %v38_v5 = vpop.permute.xlu1 %37  }
  0x7d   :  { %34 = vst.msk [vmem:[#allocation0] sm:$0x1] %vm33_vm5, %v32_v4   ;;  %vm129_vm5 = vcmask 720560  }
  0x7e   :  { %379 = vrot.lane.b32.xlu0 %v451_v3, %s577_s0  ;;  %40 = vst.msk [vmem:[#allocation0] sm:$0x1] %vm39_vm6, %v38_v5   ;;  %vm135_vm6 = vcmask 704160  }
  0x80   :  { %v44_v6 = vpop.permute.xlu0 %43   ;;  %v50_v7 = vpop.permute.xlu1 %49  }
  0x81   :  { %46 = vst.msk [vmem:[#allocation0] sm:$0x1] %vm45_vm7, %v44_v6   ;;  %vm141_vm7 = vcmask 687760  }
  0x82   :  { %52 = vst.msk [vmem:[#allocation0] sm:$0x1] %vm51_vm8, %v50_v7   ;;  %vm147_vm8 = vcmask 671360  }
  0x84   :  { %v56_v8 = vpop.permute.xlu0 %55   ;;  %v62_v9 = vpop.permute.xlu1 %61  }
  0x85   :  { %58 = vst.msk [vmem:[#allocation0] sm:$0x1] %vm57_vm9, %v56_v8   ;;  %vm153_vm9 = vcmask 654960  }
  0x86   :  { %64 = vst.msk [vmem:[#allocation0] sm:$0x1] %vm63_vm10, %v62_v9   ;;  %vm159_vm10 = vcmask 638560  }
  0x88   :  { %v68_v10 = vpop.permute.xlu0 %67   ;;  %v74_v11 = vpop.permute.xlu1 %73  }
  0x89   :  { %70 = vst.msk [vmem:[#allocation0] sm:$0x1] %vm69_vm11, %v68_v10   ;;  %vm165_vm11 = vcmask 622160  }
  0x8a   :  { %76 = vst.msk [vmem:[#allocation0] sm:$0x1] %vm75_vm12, %v74_v11   ;;  %vm171_vm12 = vcmask 605760  }
  0x8c   :  { %v80_v12 = vpop.permute.xlu0 %79   ;;  %v86_v13 = vpop.permute.xlu1 %85  }
  0x8d   :  { %82 = vst.msk [vmem:[#allocation0] sm:$0x1] %vm81_vm13, %v80_v12   ;;  %vm177_vm13 = vcmask 589360  }
  0x8e   :  { %88 = vst.msk [vmem:[#allocation0] sm:$0x1] %vm87_vm14, %v86_v13   ;;  %vm183_vm14 = vcmask 572960  }
  0x90   :  { %v92_v14 = vpop.permute.xlu0 %91   ;;  %v98_v15 = vpop.permute.xlu1 %97  }
  0x91   :  { %94 = vst.msk [vmem:[#allocation0] sm:$0x1] %vm93_vm15, %v92_v14   ;;  %vm189_vm15 = vcmask 556560  }
  0x92   :  { %100 = vst.msk [vmem:[#allocation0] sm:$0x1] %vm99_vm0, %v98_v15   ;;  %vm195_vm0 = vcmask 540160  }
  0x94   :  { %v104_v16 = vpop.permute.xlu0 %103   ;;  %v110_v17 = vpop.permute.xlu1 %109  }
  0x95   :  { %106 = vst.msk [vmem:[#allocation0] sm:$0x1] %vm105_vm1, %v104_v16   ;;  %vm201_vm1 = vcmask 523760  }
  0x96   :  { %112 = vst.msk [vmem:[#allocation0] sm:$0x1] %vm111_vm2, %v110_v17   ;;  %vm207_vm2 = vcmask 507360  }
  0x98   :  { %v116_v18 = vpop.permute.xlu0 %115   ;;  %v122_v19 = vpop.permute.xlu1 %121  }
  0x99   :  { %118 = vst.msk [vmem:[#allocation0] sm:$0x1] %vm117_vm3, %v116_v18   ;;  %vm213_vm3 = vcmask 490960  }
  0x9a   :  { %124 = vst.msk [vmem:[#allocation0] sm:$0x1] %vm123_vm4, %v122_v19   ;;  %vm219_vm4 = vcmask 474560  }
  0x9c   :  { %v128_v20 = vpop.permute.xlu0 %127   ;;  %v134_v21 = vpop.permute.xlu1 %133  }
  0x9d   :  { %130 = vst.msk [vmem:[#allocation0] sm:$0x1] %vm129_vm5, %v128_v20   ;;  %vm225_vm5 = vcmask 458160  }
  0x9e   :  { %136 = vst.msk [vmem:[#allocation0] sm:$0x1] %vm135_vm6, %v134_v21   ;;  %vm231_vm6 = vcmask 441760  }
  0xa0   :  { %v140_v22 = vpop.permute.xlu0 %139   ;;  %v146_v23 = vpop.permute.xlu1 %145  }
  0xa1   :  { %142 = vst.msk [vmem:[#allocation0] sm:$0x1] %vm141_vm7, %v140_v22   ;;  %vm237_vm7 = vcmask 425360  }
  0xa2   :  { %148 = vst.msk [vmem:[#allocation0] sm:$0x1] %vm147_vm8, %v146_v23   ;;  %vm243_vm8 = vcmask 408960  }
  0xa4   :  { %v152_v24 = vpop.permute.xlu0 %151   ;;  %v158_v25 = vpop.permute.xlu1 %157  }
  0xa5   :  { %154 = vst.msk [vmem:[#allocation0] sm:$0x1] %vm153_vm9, %v152_v24   ;;  %vm249_vm9 = vcmask 392560  }
  0xa6   :  { %160 = vst.msk [vmem:[#allocation0] sm:$0x1] %vm159_vm10, %v158_v25   ;;  %vm255_vm10 = vcmask 376160  }
  0xa8   :  { %v164_v26 = vpop.permute.xlu0 %163   ;;  %v170_v27 = vpop.permute.xlu1 %169  }
  0xa9   :  { %166 = vst.msk [vmem:[#allocation0] sm:$0x1] %vm165_vm11, %v164_v26   ;;  %vm261_vm11 = vcmask 359760  }
  0xaa   :  { %172 = vst.msk [vmem:[#allocation0] sm:$0x1] %vm171_vm12, %v170_v27   ;;  %vm267_vm12 = vcmask 343360  }
  0xac   :  { %v176_v28 = vpop.permute.xlu0 %175   ;;  %v182_v29 = vpop.permute.xlu1 %181  }
  0xad   :  { %178 = vst.msk [vmem:[#allocation0] sm:$0x1] %vm177_vm13, %v176_v28   ;;  %vm273_vm13 = vcmask 326960  }
  0xae   :  { %184 = vst.msk [vmem:[#allocation0] sm:$0x1] %vm183_vm14, %v182_v29   ;;  %vm279_vm14 = vcmask 310560  }
  0xb0   :  { %v188_v30 = vpop.permute.xlu0 %187   ;;  %v194_v31 = vpop.permute.xlu1 %193  }
  0xb1   :  { %190 = vst.msk [vmem:[#allocation0] sm:$0x1] %vm189_vm15, %v188_v30   ;;  %vm285_vm15 = vcmask 294160  }
  0xb2   :  { %196 = vst.msk [vmem:[#allocation0] sm:$0x1] %vm195_vm0, %v194_v31   ;;  %vm291_vm0 = vcmask 277760  }
  0xb4   :  { %v200_v32 = vpop.permute.xlu0 %199   ;;  %v206_v33 = vpop.permute.xlu1 %205  }
  0xb5   :  { %202 = vst.msk [vmem:[#allocation0] sm:$0x1] %vm201_vm1, %v200_v32   ;;  %vm297_vm1 = vcmask 261360  }
  0xb6   :  { %208 = vst.msk [vmem:[#allocation0] sm:$0x1] %vm207_vm2, %v206_v33   ;;  %vm303_vm2 = vcmask 244960  }
  0xb8   :  { %v212_v34 = vpop.permute.xlu0 %211   ;;  %v218_v35 = vpop.permute.xlu1 %217  }
  0xb9   :  { %214 = vst.msk [vmem:[#allocation0] sm:$0x1] %vm213_vm3, %v212_v34   ;;  %vm309_vm3 = vcmask 228560  }
  0xba   :  { %220 = vst.msk [vmem:[#allocation0] sm:$0x1] %vm219_vm4, %v218_v35   ;;  %vm315_vm4 = vcmask 212160  }
  0xbc   :  { %v224_v36 = vpop.permute.xlu0 %223   ;;  %v230_v37 = vpop.permute.xlu1 %229  }
  0xbd   :  { %226 = vst.msk [vmem:[#allocation0] sm:$0x1] %vm225_vm5, %v224_v36   ;;  %vm321_vm5 = vcmask 195760  }
  0xbe   :  { %232 = vst.msk [vmem:[#allocation0] sm:$0x1] %vm231_vm6, %v230_v37   ;;  %vm327_vm6 = vcmask 179360  }
  0xc0   :  { %v236_v38 = vpop.permute.xlu0 %235   ;;  %v242_v39 = vpop.permute.xlu1 %241  }
  0xc1   :  { %238 = vst.msk [vmem:[#allocation0] sm:$0x1] %vm237_vm7, %v236_v38   ;;  %vm333_vm7 = vcmask 162960  }
  0xc2   :  { %244 = vst.msk [vmem:[#allocation0] sm:$0x1] %vm243_vm8, %v242_v39   ;;  %vm339_vm8 = vcmask 146560  }
  0xc4   :  { %v248_v40 = vpop.permute.xlu0 %247   ;;  %v254_v41 = vpop.permute.xlu1 %253  }
  0xc5   :  { %250 = vst.msk [vmem:[#allocation0] sm:$0x1] %vm249_vm9, %v248_v40   ;;  %vm345_vm9 = vcmask 130160  }
  0xc6   :  { %256 = vst.msk [vmem:[#allocation0] sm:$0x1] %vm255_vm10, %v254_v41   ;;  %vm351_vm10 = vcmask 113760  }
  0xc8   :  { %v260_v42 = vpop.permute.xlu0 %259   ;;  %v266_v43 = vpop.permute.xlu1 %265  }
  0xc9   :  { %262 = vst.msk [vmem:[#allocation0] sm:$0x1] %vm261_vm11, %v260_v42   ;;  %vm357_vm11 = vcmask 97360  }
  0xca   :  { %268 = vst.msk [vmem:[#allocation0] sm:$0x1] %vm267_vm12, %v266_v43   ;;  %vm363_vm12 = vcmask 80960  }
  0xcc   :  { %v272_v44 = vpop.permute.xlu0 %271   ;;  %v278_v45 = vpop.permute.xlu1 %277  }
  0xcd   :  { %274 = vst.msk [vmem:[#allocation0] sm:$0x1] %vm273_vm13, %v272_v44   ;;  %vm369_vm13 = vcmask 64560  }
  0xce   :  { %280 = vst.msk [vmem:[#allocation0] sm:$0x1] %vm279_vm14, %v278_v45   ;;  %vm375_vm14 = vcmask 48160  }
  0xd0   :  { %v284_v46 = vpop.permute.xlu0 %283   ;;  %v290_v47 = vpop.permute.xlu1 %289  }
  0xd1   :  { %286 = vst.msk [vmem:[#allocation0] sm:$0x1] %vm285_vm15, %v284_v46   ;;  %vm381_vm15 = vcmask 31760  }
  0xd2   :  { %292 = vst.msk [vmem:[#allocation0] sm:$0x1] %vm291_vm0, %v290_v47  }
  0xd4   :  { %v296_v48 = vpop.permute.xlu0 %295   ;;  %v302_v49 = vpop.permute.xlu1 %301  }
  0xd5   :  { %298 = vst.msk [vmem:[#allocation0] sm:$0x1] %vm297_vm1, %v296_v48  }
  0xd6   :  { %304 = vst.msk [vmem:[#allocation0] sm:$0x1] %vm303_vm2, %v302_v49  }
  0xd8   :  { %v308_v50 = vpop.permute.xlu0 %307   ;;  %v314_v51 = vpop.permute.xlu1 %313  }
  0xd9   :  { %310 = vst.msk [vmem:[#allocation0] sm:$0x1] %vm309_vm3, %v308_v50  }
  0xda   :  { %316 = vst.msk [vmem:[#allocation0] sm:$0x1] %vm315_vm4, %v314_v51  }
  0xdc   :  { %v320_v52 = vpop.permute.xlu0 %319   ;;  %v326_v53 = vpop.permute.xlu1 %325  }
  0xdd   :  { %322 = vst.msk [vmem:[#allocation0] sm:$0x1] %vm321_vm5, %v320_v52  }
  0xde   :  { %328 = vst.msk [vmem:[#allocation0] sm:$0x1] %vm327_vm6, %v326_v53  }
  0xe0   :  { %v332_v54 = vpop.permute.xlu0 %331   ;;  %v338_v55 = vpop.permute.xlu1 %337  }
  0xe1   :  { %334 = vst.msk [vmem:[#allocation0] sm:$0x1] %vm333_vm7, %v332_v54  }
  0xe2   :  { %340 = vst.msk [vmem:[#allocation0] sm:$0x1] %vm339_vm8, %v338_v55  }
  0xe4   :  { %v344_v56 = vpop.permute.xlu0 %343   ;;  %v350_v57 = vpop.permute.xlu1 %349  }
  0xe5   :  { %346 = vst.msk [vmem:[#allocation0] sm:$0x1] %vm345_vm9, %v344_v56  }
  0xe6   :  { %352 = vst.msk [vmem:[#allocation0] sm:$0x1] %vm351_vm10, %v350_v57  }
  0xe8   :  { %v356_v58 = vpop.permute.xlu0 %355   ;;  %v362_v59 = vpop.permute.xlu1 %361  }
  0xe9   :  { %358 = vst.msk [vmem:[#allocation0] sm:$0x1] %vm357_vm11, %v356_v58  }
  0xea   :  { %364 = vst.msk [vmem:[#allocation0] sm:$0x1] %vm363_vm12, %v362_v59  }
  0xec   :  { %v368_v60 = vpop.permute.xlu0 %367   ;;  %v374_v61 = vpop.permute.xlu1 %373  }
  0xed   :  { %370 = vst.msk [vmem:[#allocation0] sm:$0x1] %vm369_vm13, %v368_v60  }
  0xee   :  { %376 = vst.msk [vmem:[#allocation0] sm:$0x1] %vm375_vm14, %v374_v61  }
  0xf0   :  { %v380_v62 = vpop.permute.xlu0 %379  }
  0xf1   :  { %382 = vst.msk [vmem:[#allocation0] sm:$0x1] %vm381_vm15, %v380_v62  }
  0xf8   :  { %v386_v63 = vld [vmem:[#allocation0] sm:$0x1] }
  0xf9   :  { %388 = vst [vmem:[%s784_s1] sm:$0x1] %v386_v63 }

// kernel: tile.33
= control target key start
LH: loop header
LB: loop body
LE: loop exit
PB: predicated region body
PF: predicated region fallthrough
CT: control target
= control target key end

     0   :  { %s28_s0 = inlined_call_operand.vmem [shape: f32[2], index: 0, kind: input, shape index: {}]   ;;  %s29_s1 = inlined_call_operand.vmem [shape: f32[16,2], index: 1, kind: output, shape index: {}]  }
   0x1   :  { %v4_v0 = vld [vmem:[%s28_s0] ss:$0 sm:$0xff] }
   0x2   :  { %5 = vst [vmem:[%s29_s1] sm:$0xff] %v4_v0  ;;  %8 = vst [vmem:[%s29_s1 + $0x8] sm:$0xff] %v4_v0 }

// kernel: tile.34
= control target key start
LH: loop header
LB: loop body
LE: loop exit
PB: predicated region body
PF: predicated region fallthrough
CT: control target
= control target key end

     0   :  { %s131_s10 = smov 30   ;;  %s132_s11 = smov 26   ;;  %vm3_vm0 = vcmask 15360   ;;  %vm9_vm1 = vcmask 261360   ;;  %vm15_vm2 = vcmask 244960   ;;  %vm21_vm3 = vcmask 228560   ;;  %s207_s0 = inlined_call_operand.vmem [shape: f32[16,2], index: 0, kind: input, shape index: {}]   ;;  %s208_s1 = inlined_call_operand.vmem [shape: f32[1,32], index: 1, kind: output, shape index: {}]  }
   0x1   :  { %v101_v0 = vld [vmem:[%s207_s0 + $0xf] sm:$0x1]   ;;  %v103_v1 = vld [vmem:[%s207_s0 + $0xd] sm:$0x1]   ;;  %v102_v2 = vld [vmem:[%s207_s0 + $0xe] sm:$0x1]  }
   0x2   :  { %7 = vrot.lane.b32.xlu0 %v101_v0, %s131_s10  ;;  %19 = vrot.lane.b32.xlu1 %v103_v1, %s132_s11  ;;  %v104_v3 = vld [vmem:[%s207_s0 + $0xc] sm:$0x1]   ;;  %s133_s16 = smov 28   ;;  %s134_s17 = smov 24   ;;  %v105_v4 = vld [vmem:[%s207_s0 + $0xb] sm:$0x1]  }
   0x3   :  { %v106_v5 = vld [vmem:[%s207_s0 + $0xa] sm:$0x1]   ;;  %v2_v6 = vld [vmem:[%s207_s0] sm:$0x1]   ;;  %s135_s24 = smov 22   ;;  %s136_s25 = smov 20  }
   0x4   :  { %4 = vst.msk [vmem:[#allocation0] sm:$0x1] %vm3_vm0, %v2_v6   ;;  %v107_v7 = vld [vmem:[%s207_s0 + $0x9] sm:$0x1]   ;;  %v108_v8 = vld [vmem:[%s207_s0 + $0x8] sm:$0x1]  }
   0x5   :  { %s137_s30 = smov 18   ;;  %s138_s2 = smov 16   ;;  %v109_v9 = vld [vmem:[%s207_s0 + $0x7] sm:$0x1]   ;;  %v110_v10 = vld [vmem:[%s207_s0 + $0x6] sm:$0x1]  }
   0x6   :  { %13 = vrot.lane.b32.xlu0 %v102_v2, %s133_s16  ;;  %25 = vrot.lane.b32.xlu1 %v104_v3, %s134_s17  ;;  %s139_s7 = smov 14   ;;  %s140_s8 = smov 12   ;;  %v111_v11 = vld [vmem:[%s207_s0 + $0x5] sm:$0x1]   ;;  %v112_v12 = vld [vmem:[%s207_s0 + $0x4] sm:$0x1]  }
   0x7   :  { %s141_s13 = smov 10   ;;  %s142_s14 = smov 8   ;;  %v113_v13 = vld [vmem:[%s207_s0 + $0x3] sm:$0x1]   ;;  %v114_v14 = vld [vmem:[%s207_s0 + $0x2] sm:$0x1]  }
   0x8   :  { %s143_s19 = smov 6   ;;  %s144_s20 = smov 4   ;;  %v115_v15 = vld [vmem:[%s207_s0 + $0x1] sm:$0x1]   ;;  %vm27_vm4 = vcmask 212160   ;;  %vm33_vm5 = vcmask 195760  }
   0x9   :  { %s145_s0 = smov 2   ;;  %vm39_vm6 = vcmask 179360   ;;  %vm45_vm7 = vcmask 162960   ;;  %vm51_vm8 = vcmask 146560   ;;  %vm57_vm9 = vcmask 130160  }
   0xa   :  { %31 = vrot.lane.b32.xlu0 %v105_v4, %s135_s24  ;;  %37 = vrot.lane.b32.xlu1 %v106_v5, %s136_s25  ;;  %vm63_vm10 = vcmask 113760   ;;  %vm69_vm11 = vcmask 97360   ;;  %vm75_vm12 = vcmask 80960   ;;  %vm81_vm13 = vcmask 64560  }
   0xb   :  { %vm87_vm14 = vcmask 48160   ;;  %vm93_vm15 = vcmask 31760  }
   0xe   :  { %43 = vrot.lane.b32.xlu0 %v107_v7, %s137_s30  ;;  %49 = vrot.lane.b32.xlu1 %v108_v8, %s138_s2 }
  0x12   :  { %55 = vrot.lane.b32.xlu0 %v109_v9, %s139_s7  ;;  %61 = vrot.lane.b32.xlu1 %v110_v10, %s140_s8 }
  0x16   :  { %67 = vrot.lane.b32.xlu0 %v111_v11, %s141_s13  ;;  %73 = vrot.lane.b32.xlu1 %v112_v12, %s142_s14 }
  0x1a   :  { %79 = vrot.lane.b32.xlu0 %v113_v13, %s143_s19  ;;  %85 = vrot.lane.b32.xlu1 %v114_v14, %s144_s20 }
  0x1e   :  { %91 = vrot.lane.b32.xlu0 %v115_v15, %s145_s0 }
  0x74   :  { %v8_v16 = vpop.permute.xlu0 %7   ;;  %v20_v17 = vpop.permute.xlu1 %19  }
  0x75   :  { %10 = vst.msk [vmem:[#allocation0] sm:$0x1] %vm9_vm1, %v8_v16  }
  0x78   :  { %v14_v18 = vpop.permute.xlu0 %13   ;;  %v26_v19 = vpop.permute.xlu1 %25  }
  0x79   :  { %16 = vst.msk [vmem:[#allocation0] sm:$0x1] %vm15_vm2, %v14_v18  }
  0x7a   :  { %22 = vst.msk [vmem:[#allocation0] sm:$0x1] %vm21_vm3, %v20_v17  }
  0x7b   :  { %28 = vst.msk [vmem:[#allocation0] sm:$0x1] %vm27_vm4, %v26_v19  }
  0x7c   :  { %v32_v20 = vpop.permute.xlu0 %31   ;;  %v38_v21 = vpop.permute.xlu1 %37  }
  0x7d   :  { %34 = vst.msk [vmem:[#allocation0] sm:$0x1] %vm33_vm5, %v32_v20  }
  0x7e   :  { %40 = vst.msk [vmem:[#allocation0] sm:$0x1] %vm39_vm6, %v38_v21  }
  0x80   :  { %v44_v22 = vpop.permute.xlu0 %43   ;;  %v50_v23 = vpop.permute.xlu1 %49  }
  0x81   :  { %46 = vst.msk [vmem:[#allocation0] sm:$0x1] %vm45_vm7, %v44_v22  }
  0x82   :  { %52 = vst.msk [vmem:[#allocation0] sm:$0x1] %vm51_vm8, %v50_v23  }
  0x84   :  { %v56_v24 = vpop.permute.xlu0 %55   ;;  %v62_v25 = vpop.permute.xlu1 %61  }
  0x85   :  { %58 = vst.msk [vmem:[#allocation0] sm:$0x1] %vm57_vm9, %v56_v24  }
  0x86   :  { %64 = vst.msk [vmem:[#allocation0] sm:$0x1] %vm63_vm10, %v62_v25  }
  0x88   :  { %v68_v26 = vpop.permute.xlu0 %67   ;;  %v74_v27 = vpop.permute.xlu1 %73  }
  0x89   :  { %70 = vst.msk [vmem:[#allocation0] sm:$0x1] %vm69_vm11, %v68_v26  }
  0x8a   :  { %76 = vst.msk [vmem:[#allocation0] sm:$0x1] %vm75_vm12, %v74_v27  }
  0x8c   :  { %v80_v28 = vpop.permute.xlu0 %79   ;;  %v86_v29 = vpop.permute.xlu1 %85  }
  0x8d   :  { %82 = vst.msk [vmem:[#allocation0] sm:$0x1] %vm81_vm13, %v80_v28  }
  0x8e   :  { %88 = vst.msk [vmem:[#allocation0] sm:$0x1] %vm87_vm14, %v86_v29  }
  0x90   :  { %v92_v30 = vpop.permute.xlu0 %91  }
  0x91   :  { %94 = vst.msk [vmem:[#allocation0] sm:$0x1] %vm93_vm15, %v92_v30  }
  0x98   :  { %v98_v31 = vld [vmem:[#allocation0] sm:$0x1] }
  0x99   :  { %100 = vst [vmem:[%s208_s1] sm:$0x1] %v98_v31 }

// kernel: upsampling_bottleneck.1
= control target key start
LH: loop header
LB: loop body
LE: loop exit
PB: predicated region body
PF: predicated region fallthrough
CT: control target
= control target key end

     0   :  { %s1468_s13 = smov 0   ;;  %s2061_s0 = inlined_call_operand.vmem [shape: f32[32,128], index: 0, kind: input, shape index: {}]   ;;  %s2062_s1 = inlined_call_operand.vmem [shape: f32[32,512], index: 1, kind: input, shape index: {}]   ;;  %s2063_s2 = inlined_call_operand.vmem [shape: f32[128,32], index: 2, kind: input, shape index: {}]   ;;  %s2064_s3 = inlined_call_operand.vmem [shape: f32[1,32], index: 3, kind: input, shape index: {}]   ;;  %s2065_s4 = inlined_call_operand.vmem [shape: f32[32,128], index: 4, kind: input, shape index: {}]   ;;  %s2066_s5 = inlined_call_operand.vmem [shape: f32[1,128], index: 5, kind: input, shape index: {}]   ;;  %s2067_s6 = inlined_call_operand.vmem [shape: f32[128,256], index: 6, kind: input, shape index: {}]   ;;  %s2068_s7 = inlined_call_operand.vmem [shape: f32[1,256], index: 7, kind: input, shape index: {}]   ;;  %s2069_s8 = inlined_call_operand.vmem [shape: f32[512,256], index: 8, kind: input, shape index: {}]   ;;  %s2070_s9 = inlined_call_operand.vmem [shape: f32[1,256], index: 9, kind: input, shape index: {}]   ;;  %s2071_s10 = inlined_call_operand.vmem [shape: f32[32,256], index: 10, kind: output, shape index: {}]  }
   0x1 LB: > { %s1096_s14 = sadd.s32 4294967295, %s1410_s13   ;;  %p1100_p0 = scmp.ge.s32.totalorder %s1410_s13, 1  ;;  %s1410_s13 = sphi %s1468_s13, %s20_s13  }
   0x2   : > { %p325_p1 = scmp.lt.s32.totalorder %s1410_s13, 3 }
   0x4   : > { %p326_p2 = pnand %p1100_p0, %p325_p1 }
   0x5   : > { %v392_v0 = vld [vmem:[%s2063_s2] sm:$0xff] (!%p326_p2)  ;;  %v393_v1 = vld [vmem:[%s2063_s2 + $0x8] sm:$0xff] (!%p326_p2)  ;;  %v394_v2 = vld [vmem:[%s2063_s2 + $0x10] sm:$0xff] (!%p326_p2)  ;;  %s1101_s21 = sshll.u32 (!%p326_p2), %s1096_s14, 1  ;;  %vm503_vm0 = vcmask (!%p326_p2), 261120  }
   0x6   : > { %329 = sbr.rel (%p326_p2) target bundleno = 765 (0x2fd), region = 60  ;;  %v1187_v3 = vpack.c.bf16 (!%p326_p2), %v393_v1, %v392_v0  ;;  %v395_v4 = vld [vmem:[%s2063_s2 + $0x18] sm:$0xff] (!%p326_p2)  ;;  %p371_p3 = scmp.lt.s32.totalorder (!%p326_p2), %s1101_s21, 3  ;;  %v396_v6 = vld [vmem:[%s2063_s2 + $0x20] sm:$0xff] (!%p326_p2)  ;;  %v397_v7 = vld [vmem:[%s2063_s2 + $0x28] sm:$0xff] (!%p326_p2) }
   0x7   : > { %v1191_v5 = vpack.c.bf16 (!%p326_p2), %v395_v4, %v394_v2  ;;  %v1195_v8 = vpack.c.bf16 (!%p326_p2), %v397_v7, %v396_v6  ;;  %v492_v9 = vld [vmem:[%s2065_s4] sm:$0xff] (!%p326_p2)  ;;  %v493_v10 = vld [vmem:[%s2065_s4 + $0x8] sm:$0xff] (!%p326_p2)  ;;  %v398_v11 = vld [vmem:[%s2063_s2 + $0x30] sm:$0xff] (!%p326_p2) }
   0x8   : > { %1188 = vmatprep.subr.bf16.mxu0 (!%p326_p2), %v1187_v3  ;;  %v399_v12 = vld [vmem:[%s2063_s2 + $0x38] sm:$0xff] (!%p326_p2)  ;;  %v1219_v13 = vpack.c.bf16 (!%p326_p2), %v493_v10, %v492_v9  ;;  %v400_v16 = vld [vmem:[%s2063_s2 + $0x40] sm:$0xff] (!%p326_p2)  ;;  %v401_v17 = vld [vmem:[%s2063_s2 + $0x48] sm:$0xff] (!%p326_p2) }
   0x9   : > { %1190 = vmatpush3.bf16.msra.mxu0 (!%p326_p2), %v1187_v3  ;;  %v1199_v15 = vpack.c.bf16 (!%p326_p2), %v399_v12, %v398_v11  ;;  %v1203_v18 = vpack.c.bf16 (!%p326_p2), %v401_v17, %v400_v16  ;;  %v402_v19 = vld [vmem:[%s2063_s2 + $0x50] sm:$0xff] (!%p326_p2)  ;;  %v403_v20 = vld [vmem:[%s2063_s2 + $0x58] sm:$0xff] (!%p326_p2)  ;;  %v404_v22 = vld [vmem:[%s2063_s2 + $0x60] sm:$0xff] (!%p326_p2) }
   0xa   : > { %1192 = vmatprep.subr.bf16.mxu0 (!%p326_p2), %v1191_v5  ;;  %1220 = vmatprep.subr.bf16.mxu1 (!%p326_p2), %v1219_v13  ;;  %v1207_v21 = vpack.c.bf16 (!%p326_p2), %v403_v20, %v402_v19  ;;  %v405_v23 = vld [vmem:[%s2063_s2 + $0x68] sm:$0xff] (!%p326_p2)  ;;  %v406_v25 = vld [vmem:[%s2063_s2 + $0x70] sm:$0xff] (!%p326_p2)  ;;  %v407_v26 = vld [vmem:[%s2063_s2 + $0x78] sm:$0xff] (!%p326_p2) }
   0xb   : > { %1222 = vmatpush3.bf16.msra.mxu1 (!%p326_p2), %v1219_v13  ;;  %v1211_v24 = vpack.c.bf16 (!%p326_p2), %v405_v23, %v404_v22  ;;  %v1215_v27 = vpack.c.bf16 (!%p326_p2), %v407_v26, %v406_v25  ;;  %v494_v29 = vld [vmem:[%s2065_s4 + $0x10] sm:$0xff] (!%p326_p2)  ;;  %v495_v30 = vld [vmem:[%s2065_s4 + $0x18] sm:$0xff] (!%p326_p2)  ;;  %v588_v32 = vld [vmem:[%s2067_s6 + $0x8] sm:$0xff] (!%p326_p2) }
   0xc   : > { %v1223_v31 = vpack.c.bf16 (!%p326_p2), %v495_v30, %v494_v29  ;;  %v590_v33 = vld [vmem:[%s2067_s6 + $0x18] sm:$0xff] (!%p326_p2)  ;;  %v1109_v35 = vld [vmem:[%s2064_s3] ss:$0 sm:$0xff] (!%p326_p2)  ;;  %v589_v40 = vld [vmem:[%s2067_s6 + $0x10] sm:$0xff] (!%p326_p2) }
   0xd   : > { %s2073_s21 = smov (!%p371_p3, %s1101_s21), 3  ;;  %1194 = vmatpush3.bf16.msra.mxu0 %v1191_v5  ;;  %v1227_v34 = vpack.c.bf16 %v590_v33, %v588_v32  ;;  %v587_v39 = vld [vmem:[%s2067_s6] sm:$0xff]  ;;  %v592_v42 = vld [vmem:[%s2067_s6 + $0x28] sm:$0xff]  ;;  %v594_v43 = vld [vmem:[%s2067_s6 + $0x38] sm:$0xff] }
   0xe   : > { %s1102_s28 = sshll.u32 %s2073_s21, 3  ;;  %1196 = vmatprep.subr.bf16.mxu0 %v1195_v8  ;;  %1224 = vmatprep.subr.bf16.mxu1 %v1223_v31  ;;  %v1229_v45 = vpack.c.bf16 %v589_v40, %v587_v39  ;;  %v1231_v47 = vpack.c.bf16 %v594_v43, %v592_v42  ;;  %v591_v48 = vld [vmem:[%s2067_s6 + $0x20] sm:$0xff]  ;;  %v593_v49 = vld [vmem:[%s2067_s6 + $0x30] sm:$0xff]  ;;  %v596_v50 = vld [vmem:[%s2067_s6 + $0x48] sm:$0xff]  ;;  %s1115_s15 = sshll.u32 %s2073_s21, 5 }
   0xf   : > { %s1512_s20 = scalar_lea.vmem %s2061_s0, %s1102_s28  ;;  %1226 = vmatpush3.bf16.msra.mxu1 %v1223_v31  ;;  %v598_v51 = vld [vmem:[%s2067_s6 + $0x58] sm:$0xff]  ;;  %v1233_v52 = vpack.c.bf16 %v593_v49, %v591_v48  ;;  %v595_v54 = vld [vmem:[%s2067_s6 + $0x40] sm:$0xff]  ;;  %v597_v55 = vld [vmem:[%s2067_s6 + $0x50] sm:$0xff]  ;;  %s1848_s28 = scalar_lea.vmem %s2062_s1, %s1115_s15 }
  0x10   : > { %v390_v14 = vld [vmem:[%s1512_s20] sm:$0xff]  ;;  %v391_v28 = vld [vmem:[%s1512_s20 + $0x8] sm:$0xff]  ;;  %1228 = vmatprep.subr.bf16.mxu1 %v1227_v34  ;;  %v1235_v53 = vpack.c.bf16 %v598_v51, %v596_v50  ;;  %v602_v57 = vld [vmem:[%s2067_s6 + $0x78] sm:$0xff]  ;;  %v1237_v58 = vpack.c.bf16 %v597_v55, %v595_v54  ;;  %s1116_s19 = sshll.u32 %s2073_s21, 4 }
  0x11   : > { %1173 = vmatprep.mubr.f32.mxu0 %v390_v14  ;;  %1198 = vmatpush3.bf16.msra.mxu0 %v1195_v8  ;;  %v600_v56 = vld [vmem:[%s2067_s6 + $0x68] sm:$0xff]  ;;  %v599_v60 = vld [vmem:[%s2067_s6 + $0x60] sm:$0xff]  ;;  %v601_v61 = vld [vmem:[%s2067_s6 + $0x70] sm:$0xff]  ;;  %s388_s24 = scalar_lea.vmem %s2071_s10, %s1116_s19 }
  0x12   : > { %1200 = vmatprep.subr.bf16.mxu0 %v1199_v15  ;;  %v1239_v59 = vpack.c.bf16 %v602_v57, %v600_v56  ;;  %v604_v62 = vld [vmem:[%s2067_s6 + $0x88] sm:$0xff]  ;;  %v606_v63 = vld [vmem:[%s2067_s6 + $0x98] sm:$0xff]  ;;  %v1241_v0 = vpack.c.bf16 %v601_v61, %v599_v60  ;;  %v603_v2 = vld [vmem:[%s2067_s6 + $0x80] sm:$0xff] }
  0x13   : > { %v1243_v1 = vpack.c.bf16 %v606_v63, %v604_v62  ;;  %v605_v3 = vld [vmem:[%s2067_s6 + $0x90] sm:$0xff]  ;;  %v608_v4 = vld [vmem:[%s2067_s6 + $0xa8] sm:$0xff]  ;;  %v610_v5 = vld [vmem:[%s2067_s6 + $0xb8] sm:$0xff] }
  0x14   : > { %v1245_v6 = vpack.c.bf16 %v605_v3, %v603_v2  ;;  %v1247_v7 = vpack.c.bf16 %v610_v5, %v608_v4  ;;  %v607_v8 = vld [vmem:[%s2067_s6 + $0xa0] sm:$0xff]  ;;  %v609_v9 = vld [vmem:[%s2067_s6 + $0xb0] sm:$0xff]  ;;  %v612_v10 = vld [vmem:[%s2067_s6 + $0xc8] sm:$0xff] }
  0x15   : > { %1202 = vmatpush3.bf16.msra.mxu0 %v1199_v15  ;;  %v614_v11 = vld [vmem:[%s2067_s6 + $0xd8] sm:$0xff]  ;;  %v1249_v12 = vpack.c.bf16 %v609_v9, %v607_v8  ;;  %v611_v14 = vld [vmem:[%s2067_s6 + $0xc0] sm:$0xff]  ;;  %v613_v15 = vld [vmem:[%s2067_s6 + $0xd0] sm:$0xff] }
  0x16   : > { %1204 = vmatprep.subr.bf16.mxu0 %v1203_v18  ;;  %v1251_v13 = vpack.c.bf16 %v614_v11, %v612_v10  ;;  %v1253_v16 = vpack.c.bf16 %v613_v15, %v611_v14  ;;  %v616_v17 = vld [vmem:[%s2067_s6 + $0xe8] sm:$0xff]  ;;  %v615_v20 = vld [vmem:[%s2067_s6 + $0xe0] sm:$0xff]  ;;  %v786_v31 = vld [vmem:[%s2069_s8 + $0x210] sm:$0xff] }
  0x17   : > { %v721_v23 = vld [vmem:[%s2069_s8 + $0x8] sm:$0xff]  ;;  %v784_v30 = vld [vmem:[%s2069_s8 + $0x200] sm:$0xff]  ;;  %v791_v34 = vld [vmem:[%s2069_s8 + $0x238] sm:$0xff] }
  0x18   : > { %v785_v26 = vld [vmem:[%s2069_s8 + $0x208] sm:$0xff]  ;;  %v1325_v32 = vpack.c.bf16 %v786_v31, %v784_v30  ;;  %v795_v40 = vld [vmem:[%s2069_s8 + $0x258] sm:$0xff]  ;;  %v794_v42 = vld [vmem:[%s2069_s8 + $0x250] sm:$0xff] }
  0x19   : > { %1206 = vmatpush3.bf16.msra.mxu0 %v1203_v18  ;;  %v618_v18 = vld [vmem:[%s2067_s6 + $0xf8] sm:$0xff]  ;;  %v789_v33 = vld [vmem:[%s2069_s8 + $0x228] sm:$0xff]  ;;  %v798_v48 = vld [vmem:[%s2069_s8 + $0x270] sm:$0xff] }
  0x1a   : > { %1208 = vmatprep.subr.bf16.mxu0 %v1207_v21  ;;  %v1255_v19 = vpack.c.bf16 %v618_v18, %v616_v17  ;;  %v793_v39 = vld [vmem:[%s2069_s8 + $0x248] sm:$0xff]  ;;  %v802_v54 = vld [vmem:[%s2069_s8 + $0x290] sm:$0xff]  ;;  %v823_v18 = vld [vmem:[%s2069_s8 + $0x338] sm:$0xff] }
  0x1b   : > { %v1331_v43 = vpack.c.bf16 %v795_v40, %v793_v39  ;;  %v801_v51 = vld [vmem:[%s2069_s8 + $0x288] sm:$0xff]  ;;  %v806_v60 = vld [vmem:[%s2069_s8 + $0x2b0] sm:$0xff]  ;;  %v831_v31 = vld [vmem:[%s2069_s8 + $0x378] sm:$0xff] }
  0x1c   : > { %v805_v57 = vld [vmem:[%s2069_s8 + $0x2a8] sm:$0xff]  ;;  %v810_v2 = vld [vmem:[%s2069_s8 + $0x2d0] sm:$0xff] }
  0x1d   : > { %1210 = vmatpush3.bf16.msra.mxu0 %v1207_v21  ;;  %v617_v21 = vld [vmem:[%s2067_s6 + $0xf0] sm:$0xff]  ;;  %v809_v63 = vld [vmem:[%s2069_s8 + $0x2c8] sm:$0xff] }
  0x1e   : > { %1212 = vmatprep.subr.bf16.mxu0 %v1211_v24  ;;  %v1257_v22 = vpack.c.bf16 %v617_v21, %v615_v20  ;;  %v813_v5 = vld [vmem:[%s2069_s8 + $0x2e8] sm:$0xff]  ;;  %v814_v8 = vld [vmem:[%s2069_s8 + $0x2f0] sm:$0xff] }
  0x1f   : > { %v817_v11 = vld [vmem:[%s2069_s8 + $0x308] sm:$0xff]  ;;  %v818_v14 = vld [vmem:[%s2069_s8 + $0x310] sm:$0xff] }
  0x20   : > { %v821_v17 = vld [vmem:[%s2069_s8 + $0x328] sm:$0xff]  ;;  %v822_v20 = vld [vmem:[%s2069_s8 + $0x330] sm:$0xff] }
  0x21   : > { %1214 = vmatpush3.bf16.msra.mxu0 %v1211_v24  ;;  %v723_v24 = vld [vmem:[%s2069_s8 + $0x18] sm:$0xff]  ;;  %v1359_v21 = vpack.c.bf16 %v823_v18, %v821_v17  ;;  %v829_v30 = vld [vmem:[%s2069_s8 + $0x368] sm:$0xff]  ;;  %v834_v39 = vld [vmem:[%s2069_s8 + $0x390] sm:$0xff] }
  0x22   : > { %1216 = vmatprep.subr.bf16.mxu0 %v1215_v27  ;;  %v1259_v25 = vpack.c.bf16 %v723_v24, %v721_v23  ;;  %v825_v23 = vld [vmem:[%s2069_s8 + $0x348] sm:$0xff]  ;;  %v827_v24 = vld [vmem:[%s2069_s8 + $0x358] sm:$0xff] }
  0x25   : > { %1218 = vmatpush3.bf16.msra.mxu0 %v1215_v27  ;;  %v787_v27 = vld [vmem:[%s2069_s8 + $0x218] sm:$0xff] }
  0x26   : > { %v1323_v29 = vpack.c.bf16 %v787_v27, %v785_v26  ;;  %v826_v26 = vld [vmem:[%s2069_s8 + $0x350] sm:$0xff]  ;;  %v1363_v27 = vpack.c.bf16 %v827_v24, %v825_v23 }
  0x28   : > { %1174 = vmatmul.mubr.f32.vlgmr.msra.gmra.mrb[0].mxu0 %v391_v28  ;;  %v1412_v28 = vmov 0.0   ;;  %1324 = vmatprep.subr.bf16.mxu0 %v1323_v29 }
  0x29   : > { %1326 = vmatpush1.bf16.msra.mxu0 %v1325_v32  ;;  %v828_v32 = vld [vmem:[%s2069_s8 + $0x360] sm:$0xff] }
  0xfb   : > { %v1175_v36 = vpop.f32.mrb[0].mxu0 }
  0xfc   : > { %v487_v37 = vadd.f32 %v1175_v36, %v1109_v35  ;;  %v481_v38 = vpop.f32.mrb[1].mxu0  ;;  %v790_v36 = vld [vmem:[%s2069_s8 + $0x230] sm:$0xff] }
  0xfd   : > { %v482_v41 = vadd.f32 %v1109_v35, %v481_v38  ;;  %v788_v35 = vld [vmem:[%s2069_s8 + $0x220] sm:$0xff] }
  0xfe   : > { %v491_v46 = vmax.f32 %v487_v37, 0.0  ;;  %v1327_v37 = vpack.c.bf16 %v791_v34, %v789_v33  ;;  %v1329_v38 = vpack.c.bf16 %v790_v36, %v788_v35  ;;  %v830_v33 = vld [vmem:[%s2069_s8 + $0x370] sm:$0xff]  ;;  %v1367_v34 = vpack.c.bf16 %v831_v31, %v829_v30  ;;  %v833_v36 = vld [vmem:[%s2069_s8 + $0x388] sm:$0xff] }
  0xff   : > { %v490_v44 = vmax.f32 %v482_v41, 0.0  ;;  %v792_v41 = vld [vmem:[%s2069_s8 + $0x240] sm:$0xff]  ;;  %v1369_v35 = vpack.c.bf16 %v830_v33, %v828_v32  ;;  %v738_v33 = vld [vmem:[%s2069_s8 + $0x90] sm:$0xff] }
 0x100   : > { %1328 = vmatprep.subr.bf16.mxu0 %v1327_v37  ;;  %v835_v37 = vld [vmem:[%s2069_s8 + $0x398] sm:$0xff]  ;;  %v736_v32 = vld [vmem:[%s2069_s8 + $0x80] sm:$0xff] }
 0x101   : > { %1184 = vmatprep.mubr.msk.f32.mxu1 %vm503_vm0, %v490_v44  ;;  %1330 = vmatpush1.bf16.msra.mxu0 %v1329_v38  ;;  %v1333_v44 = vpack.c.bf16 %v794_v42, %v792_v41  ;;  %v832_v38 = vld [vmem:[%s2069_s8 + $0x380] sm:$0xff]  ;;  %v1371_v40 = vpack.c.bf16 %v835_v37, %v833_v36  ;;  %v837_v42 = vld [vmem:[%s2069_s8 + $0x3a8] sm:$0xff]  ;;  %v1277_v36 = vpack.c.bf16 %v738_v33, %v736_v32 }
 0x102   : > { %1185 = vmatmul.mubr.msk.f32.vlgmr.msra.gmra.mrb[0].mxu1 %vm503_vm0, %v491_v46  ;;  %1332 = vmatprep.subr.bf16.mxu0 %v1331_v43  ;;  %v799_v46 = vld [vmem:[%s2069_s8 + $0x278] sm:$0xff]  ;;  %v1373_v41 = vpack.c.bf16 %v834_v39, %v832_v38  ;;  %v740_v38 = vld [vmem:[%s2069_s8 + $0xa0] sm:$0xff]  ;;  %v742_v39 = vld [vmem:[%s2069_s8 + $0xb0] sm:$0xff] }
 0x103   : > { %1230 = vmatpush1.bf16.msra.mxu1 %v1229_v45  ;;  %695 = vmatprep.mubr.f32.mxu1 %v1412_v28  ;;  %v797_v45 = vld [vmem:[%s2069_s8 + $0x268] sm:$0xff]  ;;  %v839_v43 = vld [vmem:[%s2069_s8 + $0x3b8] sm:$0xff] }
 0x104   : > { %1232 = vmatprep.subr.bf16.mxu1 %v1231_v47  ;;  %v796_v47 = vld [vmem:[%s2069_s8 + $0x260] sm:$0xff]  ;;  %v1335_v49 = vpack.c.bf16 %v799_v46, %v797_v45  ;;  %v838_v45 = vld [vmem:[%s2069_s8 + $0x3b0] sm:$0xff]  ;;  %v1375_v46 = vpack.c.bf16 %v839_v43, %v837_v42  ;;  %v1281_v42 = vpack.c.bf16 %v742_v39, %v740_v38  ;;  %v717_v38 = vld [vmem:[%s1848_s28 + $0x28] sm:$0xff] }
 0x105   : > { %1334 = vmatpush1.bf16.msra.mxu0 %v1333_v44  ;;  %v1337_v50 = vpack.c.bf16 %v798_v48, %v796_v47  ;;  %v836_v44 = vld [vmem:[%s2069_s8 + $0x3a0] sm:$0xff]  ;;  %v841_v48 = vld [vmem:[%s2069_s8 + $0x3c8] sm:$0xff] }
 0x106   : > { %1336 = vmatprep.subr.bf16.mxu0 %v1335_v49  ;;  %v1377_v47 = vpack.c.bf16 %v838_v45, %v836_v44  ;;  %v843_v49 = vld [vmem:[%s2069_s8 + $0x3d8] sm:$0xff]  ;;  %v744_v44 = vld [vmem:[%s2069_s8 + $0xc0] sm:$0xff]  ;;  %v746_v45 = vld [vmem:[%s2069_s8 + $0xd0] sm:$0xff] }
 0x107   : > { %1234 = vmatpush1.bf16.msra.mxu1 %v1233_v52  ;;  %v803_v52 = vld [vmem:[%s2069_s8 + $0x298] sm:$0xff]  ;;  %v716_v39 = vld [vmem:[%s1848_s28 + $0x20] sm:$0xff] }
 0x108   : > { %1236 = vmatprep.subr.bf16.mxu1 %v1235_v53  ;;  %v800_v53 = vld [vmem:[%s2069_s8 + $0x280] sm:$0xff]  ;;  %v1339_v55 = vpack.c.bf16 %v803_v52, %v801_v51  ;;  %v842_v51 = vld [vmem:[%s2069_s8 + $0x3d0] sm:$0xff]  ;;  %v1379_v52 = vpack.c.bf16 %v843_v49, %v841_v48  ;;  %v1285_v48 = vpack.c.bf16 %v746_v45, %v744_v44 }
 0x109   : > { %1338 = vmatpush1.bf16.msra.mxu0 %v1337_v50  ;;  %v1341_v56 = vpack.c.bf16 %v802_v54, %v800_v53  ;;  %v840_v50 = vld [vmem:[%s2069_s8 + $0x3c0] sm:$0xff]  ;;  %v845_v54 = vld [vmem:[%s2069_s8 + $0x3e8] sm:$0xff] }
 0x10a   : > { %1340 = vmatprep.subr.bf16.mxu0 %v1339_v55  ;;  %v1381_v53 = vpack.c.bf16 %v842_v51, %v840_v50  ;;  %v847_v55 = vld [vmem:[%s2069_s8 + $0x3f8] sm:$0xff]  ;;  %v748_v50 = vld [vmem:[%s2069_s8 + $0xe0] sm:$0xff]  ;;  %v750_v51 = vld [vmem:[%s2069_s8 + $0xf0] sm:$0xff] }
 0x10b   : > { %1238 = vmatpush1.bf16.msra.mxu1 %v1237_v58  ;;  %v807_v58 = vld [vmem:[%s2069_s8 + $0x2b8] sm:$0xff] }
 0x10c   : > { %1240 = vmatprep.subr.bf16.mxu1 %v1239_v59  ;;  %v804_v59 = vld [vmem:[%s2069_s8 + $0x2a0] sm:$0xff]  ;;  %v1343_v61 = vpack.c.bf16 %v807_v58, %v805_v57  ;;  %v846_v57 = vld [vmem:[%s2069_s8 + $0x3f0] sm:$0xff]  ;;  %v1383_v58 = vpack.c.bf16 %v847_v55, %v845_v54  ;;  %v1289_v54 = vpack.c.bf16 %v750_v51, %v748_v50 }
 0x10d   : > { %1342 = vmatpush1.bf16.msra.mxu0 %v1341_v56  ;;  %v1345_v62 = vpack.c.bf16 %v806_v60, %v804_v59  ;;  %v844_v56 = vld [vmem:[%s2069_s8 + $0x3e0] sm:$0xff]  ;;  %v715_v60 = vld [vmem:[%s1848_s28 + $0x18] sm:$0xff] }
 0x10e   : > { %1344 = vmatprep.subr.bf16.mxu0 %v1343_v61  ;;  %v1385_v59 = vpack.c.bf16 %v846_v57, %v844_v56  ;;  %1001 = vmatprep.mubr.f32.mxu0 %v715_v60  ;;  %v714_v61 = vld [vmem:[%s1848_s28 + $0x10] sm:$0xff]  ;;  %v752_v56 = vld [vmem:[%s2069_s8 + $0x100] sm:$0xff] }
 0x10f   : > { %1242 = vmatpush1.bf16.msra.mxu1 %v1241_v0  ;;  %v811_v0 = vld [vmem:[%s2069_s8 + $0x2d8] sm:$0xff]  ;;  %v754_v57 = vld [vmem:[%s2069_s8 + $0x110] sm:$0xff]  ;;  %v619_v51 = vld [vmem:[%s2068_s7] sm:$0x3] }
 0x110   : > { %1244 = vmatprep.subr.bf16.mxu1 %v1243_v1  ;;  %v808_v1 = vld [vmem:[%s2069_s8 + $0x2c0] sm:$0xff]  ;;  %v1347_v3 = vpack.c.bf16 %v811_v0, %v809_v63  ;;  %v718_v63 = vld [vmem:[%s1848_s28 + $0x30] sm:$0xff]  ;;  %v1293_v60 = vpack.c.bf16 %v754_v57, %v752_v56 }
 0x111   : > { %1346 = vmatpush1.bf16.msra.mxu0 %v1345_v62  ;;  %v1349_v4 = vpack.c.bf16 %v810_v2, %v808_v1  ;;  %v719_v62 = vld [vmem:[%s1848_s28 + $0x38] sm:$0xff]  ;;  %v1110_v0 = vld [vmem:[%s2066_s5] ss:$0 sm:$0xff] }
 0x112   : > { %1348 = vmatprep.subr.bf16.mxu0 %v1347_v3  ;;  %v720_v2 = vld [vmem:[%s2069_s8] sm:$0xff]  ;;  %v722_v3 = vld [vmem:[%s2069_s8 + $0x10] sm:$0xff] }
 0x113   : > { %1246 = vmatpush1.bf16.msra.mxu1 %v1245_v6  ;;  %v815_v6 = vld [vmem:[%s2069_s8 + $0x2f8] sm:$0xff] }
 0x114   : > { %1248 = vmatprep.subr.bf16.mxu1 %v1247_v7  ;;  %v812_v7 = vld [vmem:[%s2069_s8 + $0x2e0] sm:$0xff]  ;;  %v1351_v9 = vpack.c.bf16 %v815_v6, %v813_v5  ;;  %v725_v5 = vld [vmem:[%s2069_s8 + $0x28] sm:$0xff]  ;;  %v727_v6 = vld [vmem:[%s2069_s8 + $0x38] sm:$0xff] }
 0x115   : > { %1350 = vmatpush1.bf16.msra.mxu0 %v1349_v4  ;;  %v1353_v10 = vpack.c.bf16 %v814_v8, %v812_v7  ;;  %v1261_v8 = vpack.c.bf16 %v722_v3, %v720_v2 }
 0x116   : > { %1352 = vmatprep.subr.bf16.mxu0 %v1351_v9 }
 0x117   : > { %1250 = vmatpush1.bf16.msra.mxu1 %v1249_v12  ;;  %v819_v12 = vld [vmem:[%s2069_s8 + $0x318] sm:$0xff] }
 0x118   : > { %1252 = vmatprep.subr.bf16.mxu1 %v1251_v13  ;;  %v816_v13 = vld [vmem:[%s2069_s8 + $0x300] sm:$0xff]  ;;  %v1355_v15 = vpack.c.bf16 %v819_v12, %v817_v11  ;;  %v1263_v11 = vpack.c.bf16 %v727_v6, %v725_v5  ;;  %v762_v5 = vld [vmem:[%s2069_s8 + $0x150] sm:$0xff]  ;;  %v765_v6 = vld [vmem:[%s2069_s8 + $0x168] sm:$0xff] }
 0x119   : > { %1354 = vmatpush1.bf16.msra.mxu0 %v1353_v10  ;;  %v724_v12 = vld [vmem:[%s2069_s8 + $0x20] sm:$0xff] }
 0x11a   : > { %1356 = vmatprep.subr.bf16.mxu0 %v1355_v15  ;;  %v731_v15 = vld [vmem:[%s2069_s8 + $0x58] sm:$0xff] }
 0x11b   : > { %1254 = vmatpush1.bf16.msra.mxu1 %v1253_v16  ;;  %v1357_v16 = vpack.c.bf16 %v818_v14, %v816_v13  ;;  %v726_v13 = vld [vmem:[%s2069_s8 + $0x30] sm:$0xff]  ;;  %v729_v14 = vld [vmem:[%s2069_s8 + $0x48] sm:$0xff] }
 0x11c   : > { %1256 = vmatprep.subr.bf16.mxu1 %v1255_v19  ;;  %v820_v19 = vld [vmem:[%s2069_s8 + $0x320] sm:$0xff]  ;;  %v1267_v18 = vpack.c.bf16 %v731_v15, %v729_v14 }
 0x11d   : > { %1358 = vmatpush1.bf16.msra.mxu0 %v1357_v16  ;;  %v1265_v16 = vpack.c.bf16 %v726_v13, %v724_v12  ;;  %v769_v12 = vld [vmem:[%s2069_s8 + $0x188] sm:$0xff]  ;;  %v771_v13 = vld [vmem:[%s2069_s8 + $0x198] sm:$0xff] }
 0x11e   : > { %1360 = vmatprep.subr.bf16.mxu0 %v1359_v21  ;;  %v713_v21 = vld [vmem:[%s1848_s28 + $0x8] sm:$0xff]  ;;  %v1307_v15 = vpack.c.bf16 %v771_v13, %v769_v12 }
 0x11f   : > { %1258 = vmatpush1.bf16.msra.mxu1 %v1257_v22  ;;  %v1361_v22 = vpack.c.bf16 %v822_v20, %v820_v19  ;;  %v728_v19 = vld [vmem:[%s2069_s8 + $0x40] sm:$0xff]  ;;  %v730_v20 = vld [vmem:[%s2069_s8 + $0x50] sm:$0xff] }
 0x120   : > { %1260 = vmatprep.subr.bf16.mxu1 %v1259_v25  ;;  %v824_v25 = vld [vmem:[%s2069_s8 + $0x340] sm:$0xff]  ;;  %v1269_v23 = vpack.c.bf16 %v730_v20, %v728_v19  ;;  %v775_v19 = vld [vmem:[%s2069_s8 + $0x1b8] sm:$0xff] }
 0x121   : > { %1362 = vmatpush1.bf16.msra.mxu0 %v1361_v22  ;;  %v1365_v29 = vpack.c.bf16 %v826_v26, %v824_v25  ;;  %v733_v22 = vld [vmem:[%s2069_s8 + $0x68] sm:$0xff]  ;;  %v732_v25 = vld [vmem:[%s2069_s8 + $0x60] sm:$0xff]  ;;  %v734_v26 = vld [vmem:[%s2069_s8 + $0x70] sm:$0xff] }
 0x122   : > { %1364 = vmatprep.subr.bf16.mxu0 %v1363_v27  ;;  %v737_v27 = vld [vmem:[%s2069_s8 + $0x88] sm:$0xff]  ;;  %v1273_v30 = vpack.c.bf16 %v734_v26, %v732_v25 }
 0x125   : > { %1366 = vmatpush1.bf16.msra.mxu0 %v1365_v29  ;;  %v739_v29 = vld [vmem:[%s2069_s8 + $0x98] sm:$0xff] }
 0x126   : > { %1368 = vmatprep.subr.bf16.mxu0 %v1367_v34  ;;  %v1275_v31 = vpack.c.bf16 %v739_v29, %v737_v27  ;;  %v741_v34 = vld [vmem:[%s2069_s8 + $0xa8] sm:$0xff]  ;;  %v776_v27 = vld [vmem:[%s2069_s8 + $0x1c0] sm:$0xff]  ;;  %v778_v29 = vld [vmem:[%s2069_s8 + $0x1d0] sm:$0xff] }
 0x127   : > { %v1317_v32 = vpack.c.bf16 %v778_v29, %v776_v27 }
 0x129   : > { %1370 = vmatpush1.bf16.msra.mxu0 %v1369_v35  ;;  %v743_v35 = vld [vmem:[%s2069_s8 + $0xb8] sm:$0xff] }
 0x12a   : > { %1372 = vmatprep.subr.bf16.mxu0 %v1371_v40  ;;  %v1279_v37 = vpack.c.bf16 %v743_v35, %v741_v34  ;;  %v745_v40 = vld [vmem:[%s2069_s8 + $0xc8] sm:$0xff]  ;;  %v780_v34 = vld [vmem:[%s2069_s8 + $0x1e0] sm:$0xff]  ;;  %v782_v35 = vld [vmem:[%s2069_s8 + $0x1f0] sm:$0xff] }
 0x12d   : > { %1374 = vmatpush1.bf16.msra.mxu0 %v1373_v41  ;;  %v747_v41 = vld [vmem:[%s2069_s8 + $0xd8] sm:$0xff] }
 0x12e   : > { %1376 = vmatprep.subr.bf16.mxu0 %v1375_v46  ;;  %v1283_v43 = vpack.c.bf16 %v747_v41, %v745_v40  ;;  %v749_v46 = vld [vmem:[%s2069_s8 + $0xe8] sm:$0xff] }
 0x131   : > { %1378 = vmatpush1.bf16.msra.mxu0 %v1377_v47  ;;  %v751_v47 = vld [vmem:[%s2069_s8 + $0xf8] sm:$0xff] }
 0x132   : > { %1380 = vmatprep.subr.bf16.mxu0 %v1379_v52  ;;  %v1287_v49 = vpack.c.bf16 %v751_v47, %v749_v46  ;;  %v753_v52 = vld [vmem:[%s2069_s8 + $0x108] sm:$0xff] }
 0x135   : > { %1382 = vmatpush1.bf16.msra.mxu0 %v1381_v53  ;;  %v755_v53 = vld [vmem:[%s2069_s8 + $0x118] sm:$0xff] }
 0x136   : > { %1384 = vmatprep.subr.bf16.mxu0 %v1383_v58  ;;  %v1291_v55 = vpack.c.bf16 %v755_v53, %v753_v52  ;;  %v757_v58 = vld [vmem:[%s2069_s8 + $0x128] sm:$0xff]  ;;  %v848_v53 = vld [vmem:[%s2070_s9] sm:$0x3] }
 0x139   : > { %1386 = vmatpush1.bf16.msra.mxu0 %v1385_v59  ;;  %v759_v59 = vld [vmem:[%s2069_s8 + $0x138] sm:$0xff] }
 0x13c   : > { %1002 = vmatmul.mubr.f32.vlgmr.msra.gmra.mrb[2].mxu0 %v714_v61  ;;  %v1295_v61 = vpack.c.bf16 %v759_v59, %v757_v58 }
 0x13d   : > { %1007 = vmatprep.mubr.f32.mxu0 %v719_v62  ;;  %v756_v62 = vld [vmem:[%s2069_s8 + $0x120] sm:$0xff] }
 0x140   : > { %1008 = vmatmul.mubr.f32.gmra.mrb[4].mxu0 %v718_v63  ;;  %v758_v63 = vld [vmem:[%s2069_s8 + $0x130] sm:$0xff] }
 0x141   : > { %v1297_v2 = vpack.c.bf16 %v758_v63, %v756_v62 }
 0x1d5   : > { %v1186_v1 = vpop.f32.mrb[0].mxu1 }
 0x1d6   : > { %v576_v4 = vpop.f32.mrb[1].mxu1  ;;  %v582_v9 = vadd.f32 %v1186_v1, %v1110_v0  ;;  %v763_v1 = vld [vmem:[%s2069_s8 + $0x158] sm:$0xff] }
 0x1d7   : > { %v577_v7 = vadd.f32 %v1110_v0, %v576_v4  ;;  %v761_v0 = vld [vmem:[%s2069_s8 + $0x148] sm:$0xff]  ;;  %v760_v4 = vld [vmem:[%s2069_s8 + $0x140] sm:$0xff] }
 0x1d8   : > { %v586_v17 = vmax.f32 %v582_v9, 0.0  ;;  %v1299_v3 = vpack.c.bf16 %v763_v1, %v761_v0 }
 0x1d9   : > { %v585_v10 = vmax.f32 %v577_v7, 0.0  ;;  %v767_v7 = vld [vmem:[%s2069_s8 + $0x178] sm:$0xff] }
 0x1da   : > { %v1303_v9 = vpack.c.bf16 %v767_v7, %v765_v6 }
 0x1db   : > { %696 = vmatmul.mubr.f32.vlgmr.msra.gmra.mrb[2].mxu1 %v585_v10  ;;  %v764_v10 = vld [vmem:[%s2069_s8 + $0x160] sm:$0xff] }
 0x1dc   : > { %1262 = vmatpush1.bf16.msra.mxu1 %v1261_v8  ;;  %701 = vmatprep.mubr.f32.mxu1 %v1412_v28  ;;  %v735_v28 = vld [vmem:[%s2069_s8 + $0x78] sm:$0xff]  ;;  %v1301_v8 = vpack.c.bf16 %v762_v5, %v760_v4 }
 0x1dd   : > { %1264 = vmatprep.subr.bf16.mxu1 %v1263_v11  ;;  %v1271_v24 = vpack.c.bf16 %v735_v28, %v733_v22  ;;  %v766_v11 = vld [vmem:[%s2069_s8 + $0x170] sm:$0xff]  ;;  %v772_v22 = vld [vmem:[%s2069_s8 + $0x1a0] sm:$0xff] }
 0x1de   : > { %v1305_v14 = vpack.c.bf16 %v766_v11, %v764_v10  ;;  %v774_v28 = vld [vmem:[%s2069_s8 + $0x1b0] sm:$0xff] }
 0x1df   : > { %702 = vmatmul.mubr.f32.gmra.mrb[4].mxu1 %v586_v17  ;;  %v770_v17 = vld [vmem:[%s2069_s8 + $0x190] sm:$0xff]  ;;  %v1313_v25 = vpack.c.bf16 %v774_v28, %v772_v22 }
 0x1e0   : > { %1266 = vmatpush1.bf16.msra.mxu1 %v1265_v16  ;;  %924 = vmatprep.mubr.f32.mxu1 %v713_v21  ;;  %v768_v16 = vld [vmem:[%s2069_s8 + $0x180] sm:$0xff] }
 0x1e1   : > { %1268 = vmatprep.subr.bf16.mxu1 %v1267_v18  ;;  %v773_v18 = vld [vmem:[%s2069_s8 + $0x1a8] sm:$0xff]  ;;  %v1309_v20 = vpack.c.bf16 %v770_v17, %v768_v16 }
 0x1e2   : > { %v1311_v21 = vpack.c.bf16 %v775_v19, %v773_v18 }
 0x1e4   : > { %1270 = vmatpush1.bf16.msra.mxu1 %v1269_v23  ;;  %v777_v23 = vld [vmem:[%s2069_s8 + $0x1c8] sm:$0xff] }
 0x1e5   : > { %1272 = vmatprep.subr.bf16.mxu1 %v1271_v24  ;;  %v779_v24 = vld [vmem:[%s2069_s8 + $0x1d8] sm:$0xff] }
 0x1e6   : > { %v1315_v26 = vpack.c.bf16 %v779_v24, %v777_v23 }
 0x1e8   : > { %1274 = vmatpush1.bf16.msra.mxu1 %v1273_v30  ;;  %v781_v30 = vld [vmem:[%s2069_s8 + $0x1e8] sm:$0xff] }
 0x1e9   : > { %1276 = vmatprep.subr.bf16.mxu1 %v1275_v31  ;;  %v783_v31 = vld [vmem:[%s2069_s8 + $0x1f8] sm:$0xff] }
 0x1ea   : > { %v1319_v33 = vpack.c.bf16 %v783_v31, %v781_v30 }
 0x1ec   : > { %1278 = vmatpush1.bf16.msra.mxu1 %v1277_v36  ;;  %v1321_v36 = vpack.c.bf16 %v782_v35, %v780_v34 }
 0x1ed   : > { %1280 = vmatprep.subr.bf16.mxu1 %v1279_v37  ;;  %v712_v37 = vld [vmem:[%s1848_s28] sm:$0xff] }
 0x1f0   : > { %1282 = vmatpush1.bf16.msra.mxu1 %v1281_v42 }
 0x1f1   : > { %1284 = vmatprep.subr.bf16.mxu1 %v1283_v43 }
 0x1f4   : > { %1286 = vmatpush1.bf16.msra.mxu1 %v1285_v48  ;;  %v621_v48 = vlaneseq }
 0x1f5   : > { %1288 = vmatprep.subr.bf16.mxu1 %v1287_v49 }
 0x1f6   : > { %v622_v49 = vshrl.u32 %v621_v48, 7 }
 0x1f8   : > { %1290 = vmatpush1.bf16.msra.mxu1 %v1289_v54  ;;  %v623_v50 = vsub.s32 0, %v622_v49  ;;  %v627_v52 = vsub.s32 1, %v622_v49 }
 0x1f9   : > { %1292 = vmatprep.subr.bf16.mxu1 %v1291_v55 }
 0x1fa   : > { %v624_v54 = vrot.slane %v619_v51, %v623_v50  ;;  %v628_v55 = vrot.slane %v619_v51, %v627_v52  ;;  %v853_v56 = vrot.slane %v848_v53, %v623_v50  ;;  %v857_v57 = vrot.slane %v848_v53, %v627_v52 }
 0x1fc   : > { %1294 = vmatpush1.bf16.msra.mxu1 %v1293_v60 }
 0x1fd   : > { %1296 = vmatprep.subr.bf16.mxu1 %v1295_v61 }
 0x200   : > { %1298 = vmatpush1.bf16.msra.mxu1 %v1297_v2 }
 0x201   : > { %1300 = vmatprep.subr.bf16.mxu1 %v1299_v3 }
 0x204   : > { %1302 = vmatpush1.bf16.msra.mxu1 %v1301_v8 }
 0x205   : > { %1304 = vmatprep.subr.bf16.mxu1 %v1303_v9 }
 0x208   : > { %1306 = vmatpush1.bf16.msra.mxu1 %v1305_v14 }
 0x209   : > { %1308 = vmatprep.subr.bf16.mxu1 %v1307_v15 }
 0x20c   : > { %1310 = vmatpush1.bf16.msra.mxu1 %v1309_v20 }
 0x20d   : > { %1312 = vmatprep.subr.bf16.mxu1 %v1311_v21 }
 0x20f   : > { %v1003_v40 = vpop.f32.mrb[2].mxu0 }
 0x210   : > { %1314 = vmatpush1.bf16.msra.mxu1 %v1313_v25  ;;  %v1005_v41 = vpop.f32.mrb[3].mxu0 }
 0x211   : > { %1316 = vmatprep.subr.bf16.mxu1 %v1315_v26 }
 0x213   : > { %v1009_v42 = vpop.f32.mrb[4].mxu0 }
 0x214   : > { %1318 = vmatpush1.bf16.msra.mxu1 %v1317_v32  ;;  %v1011_v43 = vpop.f32.mrb[5].mxu0 }
 0x215   : > { %1320 = vmatprep.subr.bf16.mxu1 %v1319_v33 }
 0x218   : > { %1322 = vmatpush1.bf16.msra.mxu1 %v1321_v36 }
 0x21b   : > { %925 = vmatmul.mubr.f32.vlgmr.msra.gmra.mrb[6].mxu1 %v712_v37 }
 0x21c   : > { %930 = vmatprep.mubr.f32.mxu1 %v717_v38 }
 0x21f   : > { %931 = vmatmul.mubr.f32.gmra.mrb[8].mxu1 %v716_v39 }
 0x2ae   : > { %v697_v44 = vpop.f32.mrb[2].mxu1 }
 0x2af   : > { %v699_v45 = vpop.f32.mrb[3].mxu1  ;;  %v698_v58 = vadd.f32 %v697_v44, %v624_v54 }
 0x2b0   : > { %v700_v59 = vadd.f32 %v699_v45, %v628_v55 }
 0x2b1   : > { %v708_v0 = vmax.f32 %v698_v58, 0.0 }
 0x2b2   : > { %v703_v46 = vpop.f32.mrb[4].mxu1  ;;  %v709_v3 = vmax.f32 %v700_v59, 0.0 }
 0x2b3   : > { %v705_v47 = vpop.f32.mrb[5].mxu1  ;;  %v704_v1 = vadd.f32 %v703_v46, %v624_v54 }
 0x2b4   : > { %v706_v4 = vadd.f32 %v705_v47, %v628_v55 }
 0x2b5   : > { %v710_v12 = vmax.f32 %v704_v1, 0.0 }
 0x2b6   : > { %v711_v15 = vmax.f32 %v706_v4, 0.0 }
 0x2ee   : > { %v926_v60 = vpop.f32.mrb[6].mxu1 }
 0x2ef   : > { %v927_v61 = vadd.f32 %v926_v60, %v853_v56  ;;  %v928_v62 = vpop.f32.mrb[7].mxu1 }
 0x2f0   : > { %v929_v63 = vadd.f32 %v928_v62, %v857_v57 }
 0x2f1   : > { %v1004_v2 = vadd.f32 %v1003_v40, %v927_v61 }
 0x2f2   : > { %v1006_v5 = vadd.f32 %v1005_v41, %v929_v63  ;;  %v932_v6 = vpop.f32.mrb[8].mxu1 }
 0x2f3   : > { %v1014_v7 = vadd.f32 %v1004_v2, %v708_v0  ;;  %v933_v8 = vadd.f32 %v932_v6, %v853_v56  ;;  %v934_v9 = vpop.f32.mrb[9].mxu1 }
 0x2f4   : > { %v1015_v10 = vadd.f32 %v1006_v5, %v709_v3  ;;  %v935_v11 = vadd.f32 %v934_v9, %v857_v57 }
 0x2f5   : > { %v1018_v13 = vmax.f32 %v1014_v7, 0.0  ;;  %v1010_v14 = vadd.f32 %v1009_v42, %v933_v8 }
 0x2f6   : > { %v1019_v16 = vmax.f32 %v1015_v10, 0.0  ;;  %v1012_v17 = vadd.f32 %v1011_v43, %v935_v11 }
 0x2f7   : > { %1022 = vst [vmem:[%s388_s24] sm:$0xff] %v1018_v13  ;;  %v1016_v18 = vadd.f32 %v1010_v14, %v710_v12 }
 0x2f8   : > { %1023 = vst [vmem:[%s388_s24 + $0x8] sm:$0xff] %v1019_v16  ;;  %v1017_v19 = vadd.f32 %v1012_v17, %v711_v15 }
 0x2f9   : > { %v1020_v20 = vmax.f32 %v1016_v18, 0.0 }
 0x2fa   : > { %v1021_v21 = vmax.f32 %v1017_v19, 0.0 }
 0x2fb   : > { %1024 = vst [vmem:[%s388_s24 + $0x10] sm:$0xff] %v1020_v20 }
 0x2fc   : > { %1025 = vst [vmem:[%s388_s24 + $0x18] sm:$0xff] %v1021_v21 }
 0x2fd PF: > { %s20_s13 = sadd.s32 1, %s1410_s13  }
 0x2fe   : > { %p17_p4 = scmp.ge.s32.totalorder %s20_s13, 4  }
 0x300   :  { %19 = sbr.rel (!%p17_p4) target bundleno = 1 (0x1), region = 93 }

</bundles_post_ra>
